<compile_context>
chip_gen: v7x
topology: tpu7x:2x2x1
jax: 0.10.0
libtpu: 0.0.40
codegen_flags: <defaults>
</compile_context>

<pallas_src>
import functools

import jax
import jax.numpy as jnp
import numpy as np
from jax.experimental import pallas as pl
from jax.experimental.pallas import tpu as pltpu


def _make_kernel(H, W, Cin, Cout, BT):
    HW = H * W
    PAD = ((W + 1 + 127) // 128) * 128            # flat zero pad, 128-aligned
    Lp = HW + 2 * PAD
    # tap k = dy*3 + dx  ->  lane offset of its patch in the padded flat image
    tap_offsets = tuple(PAD + (dy - 1) * W + (dx - 1)
                        for dy in range(3) for dx in range(3))

    def kernel(x_ref, tv_ref, w1_ref, b1_ref, w2_ref, b2_ref, out_ref,
               xpad_ref, hpad_ref, pscr_ref):
        # {0,1} column-wrap masks along the flat spatial axis (built in-kernel).
        col = jax.lax.broadcasted_iota(jnp.int32, (1, HW), 1) % W
        ml = (col != 0).astype(jnp.bfloat16)       # left neighbour of col 0 is pad
        mr = (col != W - 1).astype(jnp.bfloat16)   # right neighbour of col W-1 is pad

        # Re-zero the padded scratches every step: trivially cheap here and
        # keeps the kernel correct under megacore "parallel" sharding of the
        # batch axis (a zero-once-at-step-0 pattern would not be).
        xpad_ref[...] = jnp.zeros_like(xpad_ref)
        hpad_ref[...] = jnp.zeros_like(hpad_ref)

        # ---- stage unpadded x into the interior of the padded scratch -------
        # (lane offset PAD is 128-aligned -> unmasked stores)
        for b in range(BT):
            xpad_ref[b, :, PAD:PAD + HW] = x_ref[b]

        # ---- im2col for conv1, written straight into the patch scratch ------
        for k, off in enumerate(tap_offsets):
            dx = k % 3
            for b in range(BT):
                p = xpad_ref[b, :, off:off + HW]               # (Cin, HW) bf16
                if dx == 0:
                    p = p * ml
                elif dx == 2:
                    p = p * mr
                pscr_ref[k * Cin:(k + 1) * Cin, b * HW:(b + 1) * HW] = p

        # ---- conv1 (3x3, pad=1): ONE MXU matmul over all BT batch elements --
        h = jnp.dot(w1_ref[...], pscr_ref[0:9 * Cin, :],
                    preferred_element_type=jnp.float32)        # (Cout, BT*HW)
        h = jnp.maximum(h + b1_ref[...], 0.0)                  # bias + ReLU (f32)

        # ---- add (wrapper-projected) time embedding, stage padded h ---------
        for b in range(BT):
            hb = h[:, b * HW:(b + 1) * HW] + tv_ref[b]         # (Cout, HW) f32
            hpad_ref[b, :, PAD:PAD + HW] = hb.astype(jnp.bfloat16)

        # ---- im2col for conv2 + fused 1x1-shortcut rows (same scratch) ------
        for k, off in enumerate(tap_offsets):
            dx = k % 3
            for b in range(BT):
                p = hpad_ref[b, :, off:off + HW]               # (Cout, HW) bf16
                if dx == 0:
                    p = p * ml
                elif dx == 2:
                    p = p * mr
                pscr_ref[k * Cout:(k + 1) * Cout, b * HW:(b + 1) * HW] = p
        for b in range(BT):                                    # shortcut rows = x
            pscr_ref[9 * Cout:9 * Cout + Cin, b * HW:(b + 1) * HW] = x_ref[b]

        # ---- conv2 (3x3) + 1x1 shortcut: ONE matmul, K = 9*Cout + Cin --------
        y = jnp.dot(w2_ref[...], pscr_ref[...],
                    preferred_element_type=jnp.float32)        # (Cout, BT*HW)
        y = jnp.maximum(y + b2_ref[...], 0.0)                  # (b2+bs) + ReLU

        # ---- lane-dense bf16 store -------------------------------------------
        for b in range(BT):
            out_ref[b] = y[:, b * HW:(b + 1) * HW].astype(out_ref.dtype)

    return kernel, PAD, Lp


def uncond_block_forward(x_nchw, t_emb, params, *, batch_tile=None):
    """Pallas UncondBlock forward. x_nchw: (B, Cin, H, W), t_emb: (B, T).
    Returns bf16 NCHW output."""
    B, Cin, H, W = x_nchw.shape
    Cout = params["w1"].shape[0]
    HW = H * W

    # Batch tile: stack BT batch elements on the matmul N (lane) axis so each
    # grid step feeds the MXU >= 256 lanes (and the per-step fixed cost is
    # amortized).  BT must divide B.
    if batch_tile is None:
        batch_tile = max(1, min(B, 512 // HW)) if HW <= 512 else 1
    bt = max(1, min(B, batch_tile))
    while B % bt:
        bt -= 1

    kernel, PAD, Lp = _make_kernel(H, W, Cin, Cout, bt)

    # --- layout plumbing (cheap XLA ops; no padding pass over x) -------------
    xf = x_nchw.reshape(B, Cin, HW).astype(jnp.bfloat16)
    # time projection hoisted out of the kernel: one (B,T)x(T,Cout) GEMM in XLA
    tvec = (t_emb.astype(jnp.float32) @ params["wt"].T.astype(jnp.float32)
            + params["bt"].astype(jnp.float32)).reshape(B, Cout, 1)

    # tap-stacked weights: column k*C + c  <->  w[o, c, dy, dx], k = dy*3 + dx
    w1s = jnp.transpose(params["w1"], (0, 2, 3, 1)).reshape(Cout, 9 * Cin)
    w2s = jnp.transpose(params["w2"], (0, 2, 3, 1)).reshape(Cout, 9 * Cout)
    w2a = jnp.concatenate([w2s, params["ws"].reshape(Cout, Cin)], axis=1)
    w1s = w1s.astype(jnp.bfloat16)
    w2a = w2a.astype(jnp.bfloat16)
    b1 = params["b1"].reshape(Cout, 1).astype(jnp.float32)
    b2s = (params["b2"] + params["bs"]).reshape(Cout, 1).astype(jnp.float32)

    grid_spec = pltpu.PrefetchScalarGridSpec(
        num_scalar_prefetch=0,
        grid=(B // bt,),
        in_specs=[
            pl.BlockSpec((bt, Cin, HW), lambda i: (i, 0, 0)),          # x (flat)
            pl.BlockSpec((bt, Cout, 1), lambda i: (i, 0, 0)),          # time vec
            pl.BlockSpec((Cout, 9 * Cin), lambda i: (0, 0)),           # conv1 taps
            pl.BlockSpec((Cout, 1), lambda i: (0, 0)),                 # b1
            pl.BlockSpec((Cout, 9 * Cout + Cin), lambda i: (0, 0)),    # conv2+shortcut
            pl.BlockSpec((Cout, 1), lambda i: (0, 0)),                 # b2 + bs
        ],
        out_specs=pl.BlockSpec((bt, Cout, HW), lambda i: (i, 0, 0)),
        scratch_shapes=[
            pltpu.VMEM((bt, Cin, Lp), jnp.bfloat16),                   # padded x
            pltpu.VMEM((bt, Cout, Lp), jnp.bfloat16),                  # padded h
            pltpu.VMEM((9 * Cout + Cin, bt * HW), jnp.bfloat16),       # im2col patches
        ],
    )

    out_flat = pl.pallas_call(
        kernel,
        out_shape=jax.ShapeDtypeStruct((B, Cout, HW), jnp.bfloat16),
        grid_spec=grid_spec,
        compiler_params=pltpu.CompilerParams(
            dimension_semantics=("parallel",)),
    )(xf, tvec, w1s, b1, w2a, b2s)

    return out_flat.reshape(B, Cout, H, W)          # NCHW (zero-copy reshape)


def reference_forward(x, t_emb, p):
    """Pure-JAX (XLA) reference matching the PyTorch module (f32)."""
    dn = ("NCHW", "OIHW", "NCHW")
    conv = functools.partial(jax.lax.conv_general_dilated,
                             window_strides=(1, 1), padding="SAME",
                             dimension_numbers=dn)
    h = conv(x, p["w1"]) + p["b1"][None, :, None, None]
    h = jnp.maximum(h, 0.0)
    h = h + (t_emb @ p["wt"].T + p["bt"])[:, :, None, None]
    h = conv(h, p["w2"]) + p["b2"][None, :, None, None]
    sc = conv(x, p["ws"]) + p["bs"][None, :, None, None]
    return jnp.maximum(h + sc, 0.0)


def init_params(key, in_channels, out_channels, time_emb_dim):
    """Deterministic synthetic parameters in PyTorch layouts."""
    ks = jax.random.split(key, 8)

    def u(k, shape, fan_in):
        bound = 1.0 / np.sqrt(fan_in)
        return jax.random.uniform(k, shape, jnp.float32, -bound, bound)

    return {
        "w1": u(ks[0], (out_channels, in_channels, 3, 3), in_channels * 9),
        "b1": u(ks[1], (out_channels,), in_channels * 9),
        "w2": u(ks[2], (out_channels, out_channels, 3, 3), out_channels * 9),
        "b2": u(ks[3], (out_channels,), out_channels * 9),
        "wt": u(ks[4], (out_channels, time_emb_dim), time_emb_dim),
        "bt": u(ks[5], (out_channels,), time_emb_dim),
        "ws": u(ks[6], (out_channels, in_channels, 1, 1), in_channels),
        "bs": u(ks[7], (out_channels,), in_channels),
    }


if __name__ == "__main__":
    B, Cin, Cout, H, W, T = 2, 4, 8, 16, 16, 32

    key = jax.random.PRNGKey(0)
    k_x, k_t, k_p = jax.random.split(key, 3)
    x = jax.random.normal(k_x, (B, Cin, H, W), jnp.float32)      # NCHW, like PyTorch
    t_emb = jax.random.normal(k_t, (B, T), jnp.float32)
    params = init_params(k_p, Cin, Cout, T)

    out = jax.block_until_ready(uncond_block_forward(x, t_emb, params))
    ref = jax.block_until_ready(reference_forward(x, t_emb, params))

    assert out.shape == (B, Cout, H, W)
    # bf16 MXU operands (f32 accumulation) + bf16 output -> loosened tolerance.
    out_f32 = np.asarray(out).astype(np.float32)
    np.testing.assert_allclose(out_f32, np.asarray(ref), rtol=3e-2, atol=3e-2)

    print("KERNEL_OK")
</pallas_src>

<mosaic_0001>
module attributes {stable_mosaic.version = 11 : i64} {
  func.func @kernel(%arg0: i32, %arg1: memref<2x4x256xbf16, #tpu.memory_space<vmem>>, %arg2: memref<2x8x1xf32, #tpu.memory_space<vmem>>, %arg3: memref<8x36xbf16, #tpu.memory_space<vmem>>, %arg4: memref<8x1xf32, #tpu.memory_space<vmem>>, %arg5: memref<8x76xbf16, #tpu.memory_space<vmem>>, %arg6: memref<8x1xf32, #tpu.memory_space<vmem>>, %arg7: memref<2x8x256xbf16, #tpu.memory_space<vmem>>, %arg8: memref<2x4x512xbf16, #tpu.memory_space<vmem>>, %arg9: memref<2x8x512xbf16, #tpu.memory_space<vmem>>, %arg10: memref<76x512xbf16, #tpu.memory_space<vmem>>) attributes {dimension_semantics = [#tpu.dimension_semantics<parallel>], iteration_bounds = array<i64: 1>, scalar_prefetch = 0 : i64, scratch_operands = 3 : i64, tpu.core_type = #tpu.core_type<tc>, window_params = [{transform_indices = @transform_0, window_bounds = array<i64: 2, 4, 256>}, {transform_indices = @transform_1, window_bounds = array<i64: 2, 8, 1>}, {pipeline_mode = #tpu.pipeline_mode<synchronous>, transform_indices = @transform_2, window_bounds = array<i64: 8, 36>}, {pipeline_mode = #tpu.pipeline_mode<synchronous>, transform_indices = @transform_3, window_bounds = array<i64: 8, 1>}, {pipeline_mode = #tpu.pipeline_mode<synchronous>, transform_indices = @transform_4, window_bounds = array<i64: 8, 76>}, {pipeline_mode = #tpu.pipeline_mode<synchronous>, transform_indices = @transform_5, window_bounds = array<i64: 8, 1>}, {transform_indices = @transform_6, window_bounds = array<i64: 2, 8, 256>}]} {
    %0 = tpu.iota {dimensions = array<i32: 1>} : vector<1x256xi32>
    %c16_i32 = arith.constant 16 : i32
    %c0_i32 = arith.constant 0 : i32
    %1 = arith.cmpi eq, %c16_i32, %c0_i32 : i32
    %c1_i32 = arith.constant 1 : i32
    %2 = arith.select %1, %c1_i32, %c16_i32 : i32
    %3 = vector.broadcast %2 : i32 to vector<1x256xi32>
    %4 = arith.remsi %0, %3 : vector<1x256xi32>
    %c0_i32_0 = arith.constant 0 : i32
    %5 = vector.broadcast %c0_i32_0 : i32 to vector<1x256xi32>
    %6 = arith.cmpi ne, %4, %5 : vector<1x256xi32>
    %c0_i32_1 = arith.constant 0 : i32
    %7 = vector.broadcast %c0_i32_1 : i32 to vector<1x256xi32>
    %8 = arith.cmpi slt, %4, %7 : vector<1x256xi32>
    %c0_i32_2 = arith.constant 0 : i32
    %9 = arith.cmpi slt, %2, %c0_i32_2 : i32
    %10 = vector.broadcast %9 : i1 to vector<1x256xi1>
    %11 = vector.broadcast %10 : vector<1x256xi1> to vector<1x256xi1>
    %12 = arith.xori %8, %11 : vector<1x256xi1>
    %13 = arith.andi %12, %6 : vector<1x256xi1>
    %14 = vector.broadcast %2 : i32 to vector<1x256xi32>
    %15 = arith.addi %4, %14 : vector<1x256xi32>
    %16 = arith.select %13, %15, %4 : vector<1x256xi1>, vector<1x256xi32>
    %c0_i32_3 = arith.constant 0 : i32
    %17 = vector.broadcast %c0_i32_3 : i32 to vector<1x256xi32>
    %18 = arith.cmpi ne, %16, %17 : vector<1x256xi32>
    %19 = arith.extui %18 : vector<1x256xi1> to vector<1x256xi32>
    %20 = arith.sitofp %19 : vector<1x256xi32> to vector<1x256xf32>
    %21 = arith.truncf %20 : vector<1x256xf32> to vector<1x256xbf16>
    %c15_i32 = arith.constant 15 : i32
    %22 = vector.broadcast %c15_i32 : i32 to vector<1x256xi32>
    %23 = arith.cmpi ne, %16, %22 : vector<1x256xi32>
    %24 = arith.extui %23 : vector<1x256xi1> to vector<1x256xi32>
    %25 = arith.sitofp %24 : vector<1x256xi32> to vector<1x256xf32>
    %26 = arith.truncf %25 : vector<1x256xf32> to vector<1x256xbf16>
    %cst = arith.constant 0.000000e+00 : bf16
    %27 = vector.broadcast %cst : bf16 to vector<2x4x512xbf16>
    %c0 = arith.constant 0 : index
    %c0_4 = arith.constant 0 : index
    %c0_5 = arith.constant 0 : index
    %28 = vector.load %arg8[%c0, %c0_4, %c0_5] : memref<2x4x512xbf16, #tpu.memory_space<vmem>>, vector<2x4x512xbf16>
    tpu.vector_store %arg8[%c0, %c0_4, %c0_5], %27 {strides = array<i32>} : memref<2x4x512xbf16, #tpu.memory_space<vmem>>, vector<2x4x512xbf16>,
    %cst_6 = arith.constant 0.000000e+00 : bf16
    %29 = vector.broadcast %cst_6 : bf16 to vector<2x8x512xbf16>
    %c0_7 = arith.constant 0 : index
    %c0_8 = arith.constant 0 : index
    %c0_9 = arith.constant 0 : index
    %30 = vector.load %arg9[%c0_7, %c0_8, %c0_9] : memref<2x8x512xbf16, #tpu.memory_space<vmem>>, vector<2x8x512xbf16>
    tpu.vector_store %arg9[%c0_7, %c0_8, %c0_9], %29 {strides = array<i32>} : memref<2x8x512xbf16, #tpu.memory_space<vmem>>, vector<2x8x512xbf16>,
    %c0_10 = arith.constant 0 : index
    %c0_11 = arith.constant 0 : index
    %c0_12 = arith.constant 0 : index
    %31 = vector.load %arg1[%c0_10, %c0_11, %c0_12] : memref<2x4x256xbf16, #tpu.memory_space<vmem>>, vector<1x4x256xbf16>
    %32 = vector.shape_cast %31 : vector<1x4x256xbf16> to vector<4x256xbf16>
    %c0_13 = arith.constant 0 : index
    %c0_14 = arith.constant 0 : index
    %c128 = arith.constant 128 : index
    %33 = vector.load %arg8[%c0_13, %c0_14, %c128] : memref<2x4x512xbf16, #tpu.memory_space<vmem>>, vector<1x4x256xbf16>
    %34 = vector.shape_cast %33 : vector<1x4x256xbf16> to vector<4x256xbf16>
    %35 = vector.shape_cast %32 : vector<4x256xbf16> to vector<1x4x256xbf16>
    tpu.vector_store %arg8[%c0_13, %c0_14, %c128], %35 {strides = array<i32>} : memref<2x4x512xbf16, #tpu.memory_space<vmem>>, vector<1x4x256xbf16>,
    %c1 = arith.constant 1 : index
    %c0_15 = arith.constant 0 : index
    %c0_16 = arith.constant 0 : index
    %36 = vector.load %arg1[%c1, %c0_15, %c0_16] : memref<2x4x256xbf16, #tpu.memory_space<vmem>>, vector<1x4x256xbf16>
    %37 = vector.shape_cast %36 : vector<1x4x256xbf16> to vector<4x256xbf16>
    %c1_17 = arith.constant 1 : index
    %c0_18 = arith.constant 0 : index
    %c128_19 = arith.constant 128 : index
    %38 = vector.load %arg8[%c1_17, %c0_18, %c128_19] : memref<2x4x512xbf16, #tpu.memory_space<vmem>>, vector<1x4x256xbf16>
    %39 = vector.shape_cast %38 : vector<1x4x256xbf16> to vector<4x256xbf16>
    %40 = vector.shape_cast %37 : vector<4x256xbf16> to vector<1x4x256xbf16>
    tpu.vector_store %arg8[%c1_17, %c0_18, %c128_19], %40 {strides = array<i32>} : memref<2x4x512xbf16, #tpu.memory_space<vmem>>, vector<1x4x256xbf16>,
    %c0_20 = arith.constant 0 : index
    %c0_21 = arith.constant 0 : index
    %c111 = arith.constant 111 : index
    %41 = vector.load %arg8[%c0_20, %c0_21, %c111] : memref<2x4x512xbf16, #tpu.memory_space<vmem>>, vector<1x4x256xbf16>
    %42 = vector.shape_cast %41 : vector<1x4x256xbf16> to vector<4x256xbf16>
    %43 = vector.broadcast %21 : vector<1x256xbf16> to vector<4x256xbf16>
    %44 = arith.mulf %42, %43 : vector<4x256xbf16>
    %c0_22 = arith.constant 0 : index
    %c0_23 = arith.constant 0 : index
    %45 = vector.load %arg10[%c0_22, %c0_23] : memref<76x512xbf16, #tpu.memory_space<vmem>>, vector<4x256xbf16>
    tpu.vector_store %arg10[%c0_22, %c0_23], %44 {strides = array<i32>} : memref<76x512xbf16, #tpu.memory_space<vmem>>, vector<4x256xbf16>,
    %c1_24 = arith.constant 1 : index
    %c0_25 = arith.constant 0 : index
    %c111_26 = arith.constant 111 : index
    %46 = vector.load %arg8[%c1_24, %c0_25, %c111_26] : memref<2x4x512xbf16, #tpu.memory_space<vmem>>, vector<1x4x256xbf16>
    %47 = vector.shape_cast %46 : vector<1x4x256xbf16> to vector<4x256xbf16>
    %48 = vector.broadcast %21 : vector<1x256xbf16> to vector<4x256xbf16>
    %49 = arith.mulf %47, %48 : vector<4x256xbf16>
    %c0_27 = arith.constant 0 : index
    %c256 = arith.constant 256 : index
    %50 = vector.load %arg10[%c0_27, %c256] : memref<76x512xbf16, #tpu.memory_space<vmem>>, vector<4x256xbf16>
    tpu.vector_store %arg10[%c0_27, %c256], %49 {strides = array<i32>} : memref<76x512xbf16, #tpu.memory_space<vmem>>, vector<4x256xbf16>,
    %c0_28 = arith.constant 0 : index
    %c0_29 = arith.constant 0 : index
    %c112 = arith.constant 112 : index
    %51 = vector.load %arg8[%c0_28, %c0_29, %c112] : memref<2x4x512xbf16, #tpu.memory_space<vmem>>, vector<1x4x256xbf16>
    %52 = vector.shape_cast %51 : vector<1x4x256xbf16> to vector<4x256xbf16>
    %c4 = arith.constant 4 : index
    %c0_30 = arith.constant 0 : index
    %53 = vector.load %arg10[%c4, %c0_30] : memref<76x512xbf16, #tpu.memory_space<vmem>>, vector<4x256xbf16>
    tpu.vector_store %arg10[%c4, %c0_30], %52 {strides = array<i32>} : memref<76x512xbf16, #tpu.memory_space<vmem>>, vector<4x256xbf16>,
    %c1_31 = arith.constant 1 : index
    %c0_32 = arith.constant 0 : index
    %c112_33 = arith.constant 112 : index
    %54 = vector.load %arg8[%c1_31, %c0_32, %c112_33] : memref<2x4x512xbf16, #tpu.memory_space<vmem>>, vector<1x4x256xbf16>
    %55 = vector.shape_cast %54 : vector<1x4x256xbf16> to vector<4x256xbf16>
    %c4_34 = arith.constant 4 : index
    %c256_35 = arith.constant 256 : index
    %56 = vector.load %arg10[%c4_34, %c256_35] : memref<76x512xbf16, #tpu.memory_space<vmem>>, vector<4x256xbf16>
    tpu.vector_store %arg10[%c4_34, %c256_35], %55 {strides = array<i32>} : memref<76x512xbf16, #tpu.memory_space<vmem>>, vector<4x256xbf16>,
    %c0_36 = arith.constant 0 : index
    %c0_37 = arith.constant 0 : index
    %c113 = arith.constant 113 : index
    %57 = vector.load %arg8[%c0_36, %c0_37, %c113] : memref<2x4x512xbf16, #tpu.memory_space<vmem>>, vector<1x4x256xbf16>
    %58 = vector.shape_cast %57 : vector<1x4x256xbf16> to vector<4x256xbf16>
    %59 = vector.broadcast %26 : vector<1x256xbf16> to vector<4x256xbf16>
    %60 = arith.mulf %58, %59 : vector<4x256xbf16>
    %c8 = arith.constant 8 : index
    %c0_38 = arith.constant 0 : index
    %61 = vector.load %arg10[%c8, %c0_38] : memref<76x512xbf16, #tpu.memory_space<vmem>>, vector<4x256xbf16>
    tpu.vector_store %arg10[%c8, %c0_38], %60 {strides = array<i32>} : memref<76x512xbf16, #tpu.memory_space<vmem>>, vector<4x256xbf16>,
    %c1_39 = arith.constant 1 : index
    %c0_40 = arith.constant 0 : index
    %c113_41 = arith.constant 113 : index
    %62 = vector.load %arg8[%c1_39, %c0_40, %c113_41] : memref<2x4x512xbf16, #tpu.memory_space<vmem>>, vector<1x4x256xbf16>
    %63 = vector.shape_cast %62 : vector<1x4x256xbf16> to vector<4x256xbf16>
    %64 = vector.broadcast %26 : vector<1x256xbf16> to vector<4x256xbf16>
    %65 = arith.mulf %63, %64 : vector<4x256xbf16>
    %c8_42 = arith.constant 8 : index
    %c256_43 = arith.constant 256 : index
    %66 = vector.load %arg10[%c8_42, %c256_43] : memref<76x512xbf16, #tpu.memory_space<vmem>>, vector<4x256xbf16>
    tpu.vector_store %arg10[%c8_42, %c256_43], %65 {strides = array<i32>} : memref<76x512xbf16, #tpu.memory_space<vmem>>, vector<4x256xbf16>,
    %c0_44 = arith.constant 0 : index
    %c0_45 = arith.constant 0 : index
    %c127 = arith.constant 127 : index
    %67 = vector.load %arg8[%c0_44, %c0_45, %c127] : memref<2x4x512xbf16, #tpu.memory_space<vmem>>, vector<1x4x256xbf16>
    %68 = vector.shape_cast %67 : vector<1x4x256xbf16> to vector<4x256xbf16>
    %69 = vector.broadcast %21 : vector<1x256xbf16> to vector<4x256xbf16>
    %70 = arith.mulf %68, %69 : vector<4x256xbf16>
    %c12 = arith.constant 12 : index
    %c0_46 = arith.constant 0 : index
    %71 = vector.load %arg10[%c12, %c0_46] : memref<76x512xbf16, #tpu.memory_space<vmem>>, vector<4x256xbf16>
    tpu.vector_store %arg10[%c12, %c0_46], %70 {strides = array<i32>} : memref<76x512xbf16, #tpu.memory_space<vmem>>, vector<4x256xbf16>,
    %c1_47 = arith.constant 1 : index
    %c0_48 = arith.constant 0 : index
    %c127_49 = arith.constant 127 : index
    %72 = vector.load %arg8[%c1_47, %c0_48, %c127_49] : memref<2x4x512xbf16, #tpu.memory_space<vmem>>, vector<1x4x256xbf16>
    %73 = vector.shape_cast %72 : vector<1x4x256xbf16> to vector<4x256xbf16>
    %74 = vector.broadcast %21 : vector<1x256xbf16> to vector<4x256xbf16>
    %75 = arith.mulf %73, %74 : vector<4x256xbf16>
    %c12_50 = arith.constant 12 : index
    %c256_51 = arith.constant 256 : index
    %76 = vector.load %arg10[%c12_50, %c256_51] : memref<76x512xbf16, #tpu.memory_space<vmem>>, vector<4x256xbf16>
    tpu.vector_store %arg10[%c12_50, %c256_51], %75 {strides = array<i32>} : memref<76x512xbf16, #tpu.memory_space<vmem>>, vector<4x256xbf16>,
    %c0_52 = arith.constant 0 : index
    %c0_53 = arith.constant 0 : index
    %c128_54 = arith.constant 128 : index
    %77 = vector.load %arg8[%c0_52, %c0_53, %c128_54] : memref<2x4x512xbf16, #tpu.memory_space<vmem>>, vector<1x4x256xbf16>
    %78 = vector.shape_cast %77 : vector<1x4x256xbf16> to vector<4x256xbf16>
    %c16 = arith.constant 16 : index
    %c0_55 = arith.constant 0 : index
    %79 = vector.load %arg10[%c16, %c0_55] : memref<76x512xbf16, #tpu.memory_space<vmem>>, vector<4x256xbf16>
    tpu.vector_store %arg10[%c16, %c0_55], %78 {strides = array<i32>} : memref<76x512xbf16, #tpu.memory_space<vmem>>, vector<4x256xbf16>,
    %c1_56 = arith.constant 1 : index
    %c0_57 = arith.constant 0 : index
    %c128_58 = arith.constant 128 : index
    %80 = vector.load %arg8[%c1_56, %c0_57, %c128_58] : memref<2x4x512xbf16, #tpu.memory_space<vmem>>, vector<1x4x256xbf16>
    %81 = vector.shape_cast %80 : vector<1x4x256xbf16> to vector<4x256xbf16>
    %c16_59 = arith.constant 16 : index
    %c256_60 = arith.constant 256 : index
    %82 = vector.load %arg10[%c16_59, %c256_60] : memref<76x512xbf16, #tpu.memory_space<vmem>>, vector<4x256xbf16>
    tpu.vector_store %arg10[%c16_59, %c256_60], %81 {strides = array<i32>} : memref<76x512xbf16, #tpu.memory_space<vmem>>, vector<4x256xbf16>,
    %c0_61 = arith.constant 0 : index
    %c0_62 = arith.constant 0 : index
    %c129 = arith.constant 129 : index
    %83 = vector.load %arg8[%c0_61, %c0_62, %c129] : memref<2x4x512xbf16, #tpu.memory_space<vmem>>, vector<1x4x256xbf16>
    %84 = vector.shape_cast %83 : vector<1x4x256xbf16> to vector<4x256xbf16>
    %85 = vector.broadcast %26 : vector<1x256xbf16> to vector<4x256xbf16>
    %86 = arith.mulf %84, %85 : vector<4x256xbf16>
    %c20 = arith.constant 20 : index
    %c0_63 = arith.constant 0 : index
    %87 = vector.load %arg10[%c20, %c0_63] : memref<76x512xbf16, #tpu.memory_space<vmem>>, vector<4x256xbf16>
    tpu.vector_store %arg10[%c20, %c0_63], %86 {strides = array<i32>} : memref<76x512xbf16, #tpu.memory_space<vmem>>, vector<4x256xbf16>,
    %c1_64 = arith.constant 1 : index
    %c0_65 = arith.constant 0 : index
    %c129_66 = arith.constant 129 : index
    %88 = vector.load %arg8[%c1_64, %c0_65, %c129_66] : memref<2x4x512xbf16, #tpu.memory_space<vmem>>, vector<1x4x256xbf16>
    %89 = vector.shape_cast %88 : vector<1x4x256xbf16> to vector<4x256xbf16>
    %90 = vector.broadcast %26 : vector<1x256xbf16> to vector<4x256xbf16>
    %91 = arith.mulf %89, %90 : vector<4x256xbf16>
    %c20_67 = arith.constant 20 : index
    %c256_68 = arith.constant 256 : index
    %92 = vector.load %arg10[%c20_67, %c256_68] : memref<76x512xbf16, #tpu.memory_space<vmem>>, vector<4x256xbf16>
    tpu.vector_store %arg10[%c20_67, %c256_68], %91 {strides = array<i32>} : memref<76x512xbf16, #tpu.memory_space<vmem>>, vector<4x256xbf16>,
    %c0_69 = arith.constant 0 : index
    %c0_70 = arith.constant 0 : index
    %c143 = arith.constant 143 : index
    %93 = vector.load %arg8[%c0_69, %c0_70, %c143] : memref<2x4x512xbf16, #tpu.memory_space<vmem>>, vector<1x4x256xbf16>
    %94 = vector.shape_cast %93 : vector<1x4x256xbf16> to vector<4x256xbf16>
    %95 = vector.broadcast %21 : vector<1x256xbf16> to vector<4x256xbf16>
    %96 = arith.mulf %94, %95 : vector<4x256xbf16>
    %c24 = arith.constant 24 : index
    %c0_71 = arith.constant 0 : index
    %97 = vector.load %arg10[%c24, %c0_71] : memref<76x512xbf16, #tpu.memory_space<vmem>>, vector<4x256xbf16>
    tpu.vector_store %arg10[%c24, %c0_71], %96 {strides = array<i32>} : memref<76x512xbf16, #tpu.memory_space<vmem>>, vector<4x256xbf16>,
    %c1_72 = arith.constant 1 : index
    %c0_73 = arith.constant 0 : index
    %c143_74 = arith.constant 143 : index
    %98 = vector.load %arg8[%c1_72, %c0_73, %c143_74] : memref<2x4x512xbf16, #tpu.memory_space<vmem>>, vector<1x4x256xbf16>
    %99 = vector.shape_cast %98 : vector<1x4x256xbf16> to vector<4x256xbf16>
    %100 = vector.broadcast %21 : vector<1x256xbf16> to vector<4x256xbf16>
    %101 = arith.mulf %99, %100 : vector<4x256xbf16>
    %c24_75 = arith.constant 24 : index
    %c256_76 = arith.constant 256 : index
    %102 = vector.load %arg10[%c24_75, %c256_76] : memref<76x512xbf16, #tpu.memory_space<vmem>>, vector<4x256xbf16>
    tpu.vector_store %arg10[%c24_75, %c256_76], %101 {strides = array<i32>} : memref<76x512xbf16, #tpu.memory_space<vmem>>, vector<4x256xbf16>,
    %c0_77 = arith.constant 0 : index
    %c0_78 = arith.constant 0 : index
    %c144 = arith.constant 144 : index
    %103 = vector.load %arg8[%c0_77, %c0_78, %c144] : memref<2x4x512xbf16, #tpu.memory_space<vmem>>, vector<1x4x256xbf16>
    %104 = vector.shape_cast %103 : vector<1x4x256xbf16> to vector<4x256xbf16>
    %c28 = arith.constant 28 : index
    %c0_79 = arith.constant 0 : index
    %105 = vector.load %arg10[%c28, %c0_79] : memref<76x512xbf16, #tpu.memory_space<vmem>>, vector<4x256xbf16>
    tpu.vector_store %arg10[%c28, %c0_79], %104 {strides = array<i32>} : memref<76x512xbf16, #tpu.memory_space<vmem>>, vector<4x256xbf16>,
    %c1_80 = arith.constant 1 : index
    %c0_81 = arith.constant 0 : index
    %c144_82 = arith.constant 144 : index
    %106 = vector.load %arg8[%c1_80, %c0_81, %c144_82] : memref<2x4x512xbf16, #tpu.memory_space<vmem>>, vector<1x4x256xbf16>
    %107 = vector.shape_cast %106 : vector<1x4x256xbf16> to vector<4x256xbf16>
    %c28_83 = arith.constant 28 : index
    %c256_84 = arith.constant 256 : index
    %108 = vector.load %arg10[%c28_83, %c256_84] : memref<76x512xbf16, #tpu.memory_space<vmem>>, vector<4x256xbf16>
    tpu.vector_store %arg10[%c28_83, %c256_84], %107 {strides = array<i32>} : memref<76x512xbf16, #tpu.memory_space<vmem>>, vector<4x256xbf16>,
    %c0_85 = arith.constant 0 : index
    %c0_86 = arith.constant 0 : index
    %c145 = arith.constant 145 : index
    %109 = vector.load %arg8[%c0_85, %c0_86, %c145] : memref<2x4x512xbf16, #tpu.memory_space<vmem>>, vector<1x4x256xbf16>
    %110 = vector.shape_cast %109 : vector<1x4x256xbf16> to vector<4x256xbf16>
    %111 = vector.broadcast %26 : vector<1x256xbf16> to vector<4x256xbf16>
    %112 = arith.mulf %110, %111 : vector<4x256xbf16>
    %c32 = arith.constant 32 : index
    %c0_87 = arith.constant 0 : index
    %113 = vector.load %arg10[%c32, %c0_87] : memref<76x512xbf16, #tpu.memory_space<vmem>>, vector<4x256xbf16>
    tpu.vector_store %arg10[%c32, %c0_87], %112 {strides = array<i32>} : memref<76x512xbf16, #tpu.memory_space<vmem>>, vector<4x256xbf16>,
    %c1_88 = arith.constant 1 : index
    %c0_89 = arith.constant 0 : index
    %c145_90 = arith.constant 145 : index
    %114 = vector.load %arg8[%c1_88, %c0_89, %c145_90] : memref<2x4x512xbf16, #tpu.memory_space<vmem>>, vector<1x4x256xbf16>
    %115 = vector.shape_cast %114 : vector<1x4x256xbf16> to vector<4x256xbf16>
    %116 = vector.broadcast %26 : vector<1x256xbf16> to vector<4x256xbf16>
    %117 = arith.mulf %115, %116 : vector<4x256xbf16>
    %c32_91 = arith.constant 32 : index
    %c256_92 = arith.constant 256 : index
    %118 = vector.load %arg10[%c32_91, %c256_92] : memref<76x512xbf16, #tpu.memory_space<vmem>>, vector<4x256xbf16>
    tpu.vector_store %arg10[%c32_91, %c256_92], %117 {strides = array<i32>} : memref<76x512xbf16, #tpu.memory_space<vmem>>, vector<4x256xbf16>,
    %c0_93 = arith.constant 0 : index
    %c0_94 = arith.constant 0 : index
    %119 = vector.load %arg3[%c0_93, %c0_94] : memref<8x36xbf16, #tpu.memory_space<vmem>>, vector<8x36xbf16>
    %c0_95 = arith.constant 0 : index
    %c0_96 = arith.constant 0 : index
    %120 = vector.load %arg10[%c0_95, %c0_96] : memref<76x512xbf16, #tpu.memory_space<vmem>>, vector<36x512xbf16>
    %cst_97 = arith.constant dense<0.000000e+00> : vector<8x512xf32>
    %121 = tpu.matmul %119, %120, %cst_97 {dimension_numbers = #tpu.dot_dimension_numbers<[1], [0], [0], [1], [0, 0, 1, 1], [], []>} : vector<8x36xbf16>, vector<36x512xbf16>, vector<8x512xf32> -> vector<8x512xf32>
    %c0_98 = arith.constant 0 : index
    %c0_99 = arith.constant 0 : index
    %122 = vector.load %arg4[%c0_98, %c0_99] : memref<8x1xf32, #tpu.memory_space<vmem>>, vector<8x1xf32>
    %123 = vector.broadcast %122 : vector<8x1xf32> to vector<8x512xf32>
    %124 = arith.addf %121, %123 : vector<8x512xf32>
    %cst_100 = arith.constant 0.000000e+00 : f32
    %125 = vector.broadcast %cst_100 : f32 to vector<8x512xf32>
    %126 = arith.maximumf %124, %125 : vector<8x512xf32>
    %127 = vector.extract_strided_slice %126 {offsets = [0, 0], sizes = [8, 256], strides = [1, 1]} : vector<8x512xf32> to vector<8x256xf32>
    %c0_101 = arith.constant 0 : index
    %c0_102 = arith.constant 0 : index
    %c0_103 = arith.constant 0 : index
    %128 = vector.load %arg2[%c0_101, %c0_102, %c0_103] : memref<2x8x1xf32, #tpu.memory_space<vmem>>, vector<1x8x1xf32>
    %129 = vector.shape_cast %128 : vector<1x8x1xf32> to vector<8x1xf32>
    %130 = vector.broadcast %129 : vector<8x1xf32> to vector<8x256xf32>
    %131 = arith.addf %127, %130 : vector<8x256xf32>
    %132 = arith.truncf %131 : vector<8x256xf32> to vector<8x256xbf16>
    %c0_104 = arith.constant 0 : index
    %c0_105 = arith.constant 0 : index
    %c128_106 = arith.constant 128 : index
    %133 = vector.load %arg9[%c0_104, %c0_105, %c128_106] : memref<2x8x512xbf16, #tpu.memory_space<vmem>>, vector<1x8x256xbf16>
    %134 = vector.shape_cast %133 : vector<1x8x256xbf16> to vector<8x256xbf16>
    %135 = vector.shape_cast %132 : vector<8x256xbf16> to vector<1x8x256xbf16>
    tpu.vector_store %arg9[%c0_104, %c0_105, %c128_106], %135 {strides = array<i32>} : memref<2x8x512xbf16, #tpu.memory_space<vmem>>, vector<1x8x256xbf16>,
    %136 = vector.extract_strided_slice %126 {offsets = [0, 256], sizes = [8, 256], strides = [1, 1]} : vector<8x512xf32> to vector<8x256xf32>
    %c1_107 = arith.constant 1 : index
    %c0_108 = arith.constant 0 : index
    %c0_109 = arith.constant 0 : index
    %137 = vector.load %arg2[%c1_107, %c0_108, %c0_109] : memref<2x8x1xf32, #tpu.memory_space<vmem>>, vector<1x8x1xf32>
    %138 = vector.shape_cast %137 : vector<1x8x1xf32> to vector<8x1xf32>
    %139 = vector.broadcast %138 : vector<8x1xf32> to vector<8x256xf32>
    %140 = arith.addf %136, %139 : vector<8x256xf32>
    %141 = arith.truncf %140 : vector<8x256xf32> to vector<8x256xbf16>
    %c1_110 = arith.constant 1 : index
    %c0_111 = arith.constant 0 : index
    %c128_112 = arith.constant 128 : index
    %142 = vector.load %arg9[%c1_110, %c0_111, %c128_112] : memref<2x8x512xbf16, #tpu.memory_space<vmem>>, vector<1x8x256xbf16>
    %143 = vector.shape_cast %142 : vector<1x8x256xbf16> to vector<8x256xbf16>
    %144 = vector.shape_cast %141 : vector<8x256xbf16> to vector<1x8x256xbf16>
    tpu.vector_store %arg9[%c1_110, %c0_111, %c128_112], %144 {strides = array<i32>} : memref<2x8x512xbf16, #tpu.memory_space<vmem>>, vector<1x8x256xbf16>,
    %c0_113 = arith.constant 0 : index
    %c0_114 = arith.constant 0 : index
    %c111_115 = arith.constant 111 : index
    %145 = vector.load %arg9[%c0_113, %c0_114, %c111_115] : memref<2x8x512xbf16, #tpu.memory_space<vmem>>, vector<1x8x256xbf16>
    %146 = vector.shape_cast %145 : vector<1x8x256xbf16> to vector<8x256xbf16>
    %147 = vector.broadcast %21 : vector<1x256xbf16> to vector<8x256xbf16>
    %148 = arith.mulf %146, %147 : vector<8x256xbf16>
    %c0_116 = arith.constant 0 : index
    %c0_117 = arith.constant 0 : index
    %149 = vector.load %arg10[%c0_116, %c0_117] : memref<76x512xbf16, #tpu.memory_space<vmem>>, vector<8x256xbf16>
    tpu.vector_store %arg10[%c0_116, %c0_117], %148 {strides = array<i32>} : memref<76x512xbf16, #tpu.memory_space<vmem>>, vector<8x256xbf16>,
    %c1_118 = arith.constant 1 : index
    %c0_119 = arith.constant 0 : index
    %c111_120 = arith.constant 111 : index
    %150 = vector.load %arg9[%c1_118, %c0_119, %c111_120] : memref<2x8x512xbf16, #tpu.memory_space<vmem>>, vector<1x8x256xbf16>
    %151 = vector.shape_cast %150 : vector<1x8x256xbf16> to vector<8x256xbf16>
    %152 = vector.broadcast %21 : vector<1x256xbf16> to vector<8x256xbf16>
    %153 = arith.mulf %151, %152 : vector<8x256xbf16>
    %c0_121 = arith.constant 0 : index
    %c256_122 = arith.constant 256 : index
    %154 = vector.load %arg10[%c0_121, %c256_122] : memref<76x512xbf16, #tpu.memory_space<vmem>>, vector<8x256xbf16>
    tpu.vector_store %arg10[%c0_121, %c256_122], %153 {strides = array<i32>} : memref<76x512xbf16, #tpu.memory_space<vmem>>, vector<8x256xbf16>,
    %c0_123 = arith.constant 0 : index
    %c0_124 = arith.constant 0 : index
    %c112_125 = arith.constant 112 : index
    %155 = vector.load %arg9[%c0_123, %c0_124, %c112_125] : memref<2x8x512xbf16, #tpu.memory_space<vmem>>, vector<1x8x256xbf16>
    %156 = vector.shape_cast %155 : vector<1x8x256xbf16> to vector<8x256xbf16>
    %c8_126 = arith.constant 8 : index
    %c0_127 = arith.constant 0 : index
    %157 = vector.load %arg10[%c8_126, %c0_127] : memref<76x512xbf16, #tpu.memory_space<vmem>>, vector<8x256xbf16>
    tpu.vector_store %arg10[%c8_126, %c0_127], %156 {strides = array<i32>} : memref<76x512xbf16, #tpu.memory_space<vmem>>, vector<8x256xbf16>,
    %c1_128 = arith.constant 1 : index
    %c0_129 = arith.constant 0 : index
    %c112_130 = arith.constant 112 : index
    %158 = vector.load %arg9[%c1_128, %c0_129, %c112_130] : memref<2x8x512xbf16, #tpu.memory_space<vmem>>, vector<1x8x256xbf16>
    %159 = vector.shape_cast %158 : vector<1x8x256xbf16> to vector<8x256xbf16>
    %c8_131 = arith.constant 8 : index
    %c256_132 = arith.constant 256 : index
    %160 = vector.load %arg10[%c8_131, %c256_132] : memref<76x512xbf16, #tpu.memory_space<vmem>>, vector<8x256xbf16>
    tpu.vector_store %arg10[%c8_131, %c256_132], %159 {strides = array<i32>} : memref<76x512xbf16, #tpu.memory_space<vmem>>, vector<8x256xbf16>,
    %c0_133 = arith.constant 0 : index
    %c0_134 = arith.constant 0 : index
    %c113_135 = arith.constant 113 : index
    %161 = vector.load %arg9[%c0_133, %c0_134, %c113_135] : memref<2x8x512xbf16, #tpu.memory_space<vmem>>, vector<1x8x256xbf16>
    %162 = vector.shape_cast %161 : vector<1x8x256xbf16> to vector<8x256xbf16>
    %163 = vector.broadcast %26 : vector<1x256xbf16> to vector<8x256xbf16>
    %164 = arith.mulf %162, %163 : vector<8x256xbf16>
    %c16_136 = arith.constant 16 : index
    %c0_137 = arith.constant 0 : index
    %165 = vector.load %arg10[%c16_136, %c0_137] : memref<76x512xbf16, #tpu.memory_space<vmem>>, vector<8x256xbf16>
    tpu.vector_store %arg10[%c16_136, %c0_137], %164 {strides = array<i32>} : memref<76x512xbf16, #tpu.memory_space<vmem>>, vector<8x256xbf16>,
    %c1_138 = arith.constant 1 : index
    %c0_139 = arith.constant 0 : index
    %c113_140 = arith.constant 113 : index
    %166 = vector.load %arg9[%c1_138, %c0_139, %c113_140] : memref<2x8x512xbf16, #tpu.memory_space<vmem>>, vector<1x8x256xbf16>
    %167 = vector.shape_cast %166 : vector<1x8x256xbf16> to vector<8x256xbf16>
    %168 = vector.broadcast %26 : vector<1x256xbf16> to vector<8x256xbf16>
    %169 = arith.mulf %167, %168 : vector<8x256xbf16>
    %c16_141 = arith.constant 16 : index
    %c256_142 = arith.constant 256 : index
    %170 = vector.load %arg10[%c16_141, %c256_142] : memref<76x512xbf16, #tpu.memory_space<vmem>>, vector<8x256xbf16>
    tpu.vector_store %arg10[%c16_141, %c256_142], %169 {strides = array<i32>} : memref<76x512xbf16, #tpu.memory_space<vmem>>, vector<8x256xbf16>,
    %c0_143 = arith.constant 0 : index
    %c0_144 = arith.constant 0 : index
    %c127_145 = arith.constant 127 : index
    %171 = vector.load %arg9[%c0_143, %c0_144, %c127_145] : memref<2x8x512xbf16, #tpu.memory_space<vmem>>, vector<1x8x256xbf16>
    %172 = vector.shape_cast %171 : vector<1x8x256xbf16> to vector<8x256xbf16>
    %173 = vector.broadcast %21 : vector<1x256xbf16> to vector<8x256xbf16>
    %174 = arith.mulf %172, %173 : vector<8x256xbf16>
    %c24_146 = arith.constant 24 : index
    %c0_147 = arith.constant 0 : index
    %175 = vector.load %arg10[%c24_146, %c0_147] : memref<76x512xbf16, #tpu.memory_space<vmem>>, vector<8x256xbf16>
    tpu.vector_store %arg10[%c24_146, %c0_147], %174 {strides = array<i32>} : memref<76x512xbf16, #tpu.memory_space<vmem>>, vector<8x256xbf16>,
    %c1_148 = arith.constant 1 : index
    %c0_149 = arith.constant 0 : index
    %c127_150 = arith.constant 127 : index
    %176 = vector.load %arg9[%c1_148, %c0_149, %c127_150] : memref<2x8x512xbf16, #tpu.memory_space<vmem>>, vector<1x8x256xbf16>
    %177 = vector.shape_cast %176 : vector<1x8x256xbf16> to vector<8x256xbf16>
    %178 = vector.broadcast %21 : vector<1x256xbf16> to vector<8x256xbf16>
    %179 = arith.mulf %177, %178 : vector<8x256xbf16>
    %c24_151 = arith.constant 24 : index
    %c256_152 = arith.constant 256 : index
    %180 = vector.load %arg10[%c24_151, %c256_152] : memref<76x512xbf16, #tpu.memory_space<vmem>>, vector<8x256xbf16>
    tpu.vector_store %arg10[%c24_151, %c256_152], %179 {strides = array<i32>} : memref<76x512xbf16, #tpu.memory_space<vmem>>, vector<8x256xbf16>,
    %c0_153 = arith.constant 0 : index
    %c0_154 = arith.constant 0 : index
    %c128_155 = arith.constant 128 : index
    %181 = vector.load %arg9[%c0_153, %c0_154, %c128_155] : memref<2x8x512xbf16, #tpu.memory_space<vmem>>, vector<1x8x256xbf16>
    %182 = vector.shape_cast %181 : vector<1x8x256xbf16> to vector<8x256xbf16>
    %c32_156 = arith.constant 32 : index
    %c0_157 = arith.constant 0 : index
    %183 = vector.load %arg10[%c32_156, %c0_157] : memref<76x512xbf16, #tpu.memory_space<vmem>>, vector<8x256xbf16>
    tpu.vector_store %arg10[%c32_156, %c0_157], %182 {strides = array<i32>} : memref<76x512xbf16, #tpu.memory_space<vmem>>, vector<8x256xbf16>,
    %c1_158 = arith.constant 1 : index
    %c0_159 = arith.constant 0 : index
    %c128_160 = arith.constant 128 : index
    %184 = vector.load %arg9[%c1_158, %c0_159, %c128_160] : memref<2x8x512xbf16, #tpu.memory_space<vmem>>, vector<1x8x256xbf16>
    %185 = vector.shape_cast %184 : vector<1x8x256xbf16> to vector<8x256xbf16>
    %c32_161 = arith.constant 32 : index
    %c256_162 = arith.constant 256 : index
    %186 = vector.load %arg10[%c32_161, %c256_162] : memref<76x512xbf16, #tpu.memory_space<vmem>>, vector<8x256xbf16>
    tpu.vector_store %arg10[%c32_161, %c256_162], %185 {strides = array<i32>} : memref<76x512xbf16, #tpu.memory_space<vmem>>, vector<8x256xbf16>,
    %c0_163 = arith.constant 0 : index
    %c0_164 = arith.constant 0 : index
    %c129_165 = arith.constant 129 : index
    %187 = vector.load %arg9[%c0_163, %c0_164, %c129_165] : memref<2x8x512xbf16, #tpu.memory_space<vmem>>, vector<1x8x256xbf16>
    %188 = vector.shape_cast %187 : vector<1x8x256xbf16> to vector<8x256xbf16>
    %189 = vector.broadcast %26 : vector<1x256xbf16> to vector<8x256xbf16>
    %190 = arith.mulf %188, %189 : vector<8x256xbf16>
    %c40 = arith.constant 40 : index
    %c0_166 = arith.constant 0 : index
    %191 = vector.load %arg10[%c40, %c0_166] : memref<76x512xbf16, #tpu.memory_space<vmem>>, vector<8x256xbf16>
    tpu.vector_store %arg10[%c40, %c0_166], %190 {strides = array<i32>} : memref<76x512xbf16, #tpu.memory_space<vmem>>, vector<8x256xbf16>,
    %c1_167 = arith.constant 1 : index
    %c0_168 = arith.constant 0 : index
    %c129_169 = arith.constant 129 : index
    %192 = vector.load %arg9[%c1_167, %c0_168, %c129_169] : memref<2x8x512xbf16, #tpu.memory_space<vmem>>, vector<1x8x256xbf16>
    %193 = vector.shape_cast %192 : vector<1x8x256xbf16> to vector<8x256xbf16>
    %194 = vector.broadcast %26 : vector<1x256xbf16> to vector<8x256xbf16>
    %195 = arith.mulf %193, %194 : vector<8x256xbf16>
    %c40_170 = arith.constant 40 : index
    %c256_171 = arith.constant 256 : index
    %196 = vector.load %arg10[%c40_170, %c256_171] : memref<76x512xbf16, #tpu.memory_space<vmem>>, vector<8x256xbf16>
    tpu.vector_store %arg10[%c40_170, %c256_171], %195 {strides = array<i32>} : memref<76x512xbf16, #tpu.memory_space<vmem>>, vector<8x256xbf16>,
    %c0_172 = arith.constant 0 : index
    %c0_173 = arith.constant 0 : index
    %c143_174 = arith.constant 143 : index
    %197 = vector.load %arg9[%c0_172, %c0_173, %c143_174] : memref<2x8x512xbf16, #tpu.memory_space<vmem>>, vector<1x8x256xbf16>
    %198 = vector.shape_cast %197 : vector<1x8x256xbf16> to vector<8x256xbf16>
    %199 = vector.broadcast %21 : vector<1x256xbf16> to vector<8x256xbf16>
    %200 = arith.mulf %198, %199 : vector<8x256xbf16>
    %c48 = arith.constant 48 : index
    %c0_175 = arith.constant 0 : index
    %201 = vector.load %arg10[%c48, %c0_175] : memref<76x512xbf16, #tpu.memory_space<vmem>>, vector<8x256xbf16>
    tpu.vector_store %arg10[%c48, %c0_175], %200 {strides = array<i32>} : memref<76x512xbf16, #tpu.memory_space<vmem>>, vector<8x256xbf16>,
    %c1_176 = arith.constant 1 : index
    %c0_177 = arith.constant 0 : index
    %c143_178 = arith.constant 143 : index
    %202 = vector.load %arg9[%c1_176, %c0_177, %c143_178] : memref<2x8x512xbf16, #tpu.memory_space<vmem>>, vector<1x8x256xbf16>
    %203 = vector.shape_cast %202 : vector<1x8x256xbf16> to vector<8x256xbf16>
    %204 = vector.broadcast %21 : vector<1x256xbf16> to vector<8x256xbf16>
    %205 = arith.mulf %203, %204 : vector<8x256xbf16>
    %c48_179 = arith.constant 48 : index
    %c256_180 = arith.constant 256 : index
    %206 = vector.load %arg10[%c48_179, %c256_180] : memref<76x512xbf16, #tpu.memory_space<vmem>>, vector<8x256xbf16>
    tpu.vector_store %arg10[%c48_179, %c256_180], %205 {strides = array<i32>} : memref<76x512xbf16, #tpu.memory_space<vmem>>, vector<8x256xbf16>,
    %c0_181 = arith.constant 0 : index
    %c0_182 = arith.constant 0 : index
    %c144_183 = arith.constant 144 : index
    %207 = vector.load %arg9[%c0_181, %c0_182, %c144_183] : memref<2x8x512xbf16, #tpu.memory_space<vmem>>, vector<1x8x256xbf16>
    %208 = vector.shape_cast %207 : vector<1x8x256xbf16> to vector<8x256xbf16>
    %c56 = arith.constant 56 : index
    %c0_184 = arith.constant 0 : index
    %209 = vector.load %arg10[%c56, %c0_184] : memref<76x512xbf16, #tpu.memory_space<vmem>>, vector<8x256xbf16>
    tpu.vector_store %arg10[%c56, %c0_184], %208 {strides = array<i32>} : memref<76x512xbf16, #tpu.memory_space<vmem>>, vector<8x256xbf16>,
    %c1_185 = arith.constant 1 : index
    %c0_186 = arith.constant 0 : index
    %c144_187 = arith.constant 144 : index
    %210 = vector.load %arg9[%c1_185, %c0_186, %c144_187] : memref<2x8x512xbf16, #tpu.memory_space<vmem>>, vector<1x8x256xbf16>
    %211 = vector.shape_cast %210 : vector<1x8x256xbf16> to vector<8x256xbf16>
    %c56_188 = arith.constant 56 : index
    %c256_189 = arith.constant 256 : index
    %212 = vector.load %arg10[%c56_188, %c256_189] : memref<76x512xbf16, #tpu.memory_space<vmem>>, vector<8x256xbf16>
    tpu.vector_store %arg10[%c56_188, %c256_189], %211 {strides = array<i32>} : memref<76x512xbf16, #tpu.memory_space<vmem>>, vector<8x256xbf16>,
    %c0_190 = arith.constant 0 : index
    %c0_191 = arith.constant 0 : index
    %c145_192 = arith.constant 145 : index
    %213 = vector.load %arg9[%c0_190, %c0_191, %c145_192] : memref<2x8x512xbf16, #tpu.memory_space<vmem>>, vector<1x8x256xbf16>
    %214 = vector.shape_cast %213 : vector<1x8x256xbf16> to vector<8x256xbf16>
    %215 = vector.broadcast %26 : vector<1x256xbf16> to vector<8x256xbf16>
    %216 = arith.mulf %214, %215 : vector<8x256xbf16>
    %c64 = arith.constant 64 : index
    %c0_193 = arith.constant 0 : index
    %217 = vector.load %arg10[%c64, %c0_193] : memref<76x512xbf16, #tpu.memory_space<vmem>>, vector<8x256xbf16>
    tpu.vector_store %arg10[%c64, %c0_193], %216 {strides = array<i32>} : memref<76x512xbf16, #tpu.memory_space<vmem>>, vector<8x256xbf16>,
    %c1_194 = arith.constant 1 : index
    %c0_195 = arith.constant 0 : index
    %c145_196 = arith.constant 145 : index
    %218 = vector.load %arg9[%c1_194, %c0_195, %c145_196] : memref<2x8x512xbf16, #tpu.memory_space<vmem>>, vector<1x8x256xbf16>
    %219 = vector.shape_cast %218 : vector<1x8x256xbf16> to vector<8x256xbf16>
    %220 = vector.broadcast %26 : vector<1x256xbf16> to vector<8x256xbf16>
    %221 = arith.mulf %219, %220 : vector<8x256xbf16>
    %c64_197 = arith.constant 64 : index
    %c256_198 = arith.constant 256 : index
    %222 = vector.load %arg10[%c64_197, %c256_198] : memref<76x512xbf16, #tpu.memory_space<vmem>>, vector<8x256xbf16>
    tpu.vector_store %arg10[%c64_197, %c256_198], %221 {strides = array<i32>} : memref<76x512xbf16, #tpu.memory_space<vmem>>, vector<8x256xbf16>,
    %c0_199 = arith.constant 0 : index
    %c0_200 = arith.constant 0 : index
    %c0_201 = arith.constant 0 : index
    %223 = vector.load %arg1[%c0_199, %c0_200, %c0_201] : memref<2x4x256xbf16, #tpu.memory_space<vmem>>, vector<1x4x256xbf16>
    %224 = vector.shape_cast %223 : vector<1x4x256xbf16> to vector<4x256xbf16>
    %c72 = arith.constant 72 : index
    %c0_202 = arith.constant 0 : index
    %225 = vector.load %arg10[%c72, %c0_202] : memref<76x512xbf16, #tpu.memory_space<vmem>>, vector<4x256xbf16>
    tpu.vector_store %arg10[%c72, %c0_202], %224 {strides = array<i32>} : memref<76x512xbf16, #tpu.memory_space<vmem>>, vector<4x256xbf16>,
    %c1_203 = arith.constant 1 : index
    %c0_204 = arith.constant 0 : index
    %c0_205 = arith.constant 0 : index
    %226 = vector.load %arg1[%c1_203, %c0_204, %c0_205] : memref<2x4x256xbf16, #tpu.memory_space<vmem>>, vector<1x4x256xbf16>
    %227 = vector.shape_cast %226 : vector<1x4x256xbf16> to vector<4x256xbf16>
    %c72_206 = arith.constant 72 : index
    %c256_207 = arith.constant 256 : index
    %228 = vector.load %arg10[%c72_206, %c256_207] : memref<76x512xbf16, #tpu.memory_space<vmem>>, vector<4x256xbf16>
    tpu.vector_store %arg10[%c72_206, %c256_207], %227 {strides = array<i32>} : memref<76x512xbf16, #tpu.memory_space<vmem>>, vector<4x256xbf16>,
    %c0_208 = arith.constant 0 : index
    %c0_209 = arith.constant 0 : index
    %229 = vector.load %arg5[%c0_208, %c0_209] : memref<8x76xbf16, #tpu.memory_space<vmem>>, vector<8x76xbf16>
    %c0_210 = arith.constant 0 : index
    %c0_211 = arith.constant 0 : index
    %230 = vector.load %arg10[%c0_210, %c0_211] : memref<76x512xbf16, #tpu.memory_space<vmem>>, vector<76x512xbf16>
    %cst_212 = arith.constant dense<0.000000e+00> : vector<8x512xf32>
    %231 = tpu.matmul %229, %230, %cst_212 {dimension_numbers = #tpu.dot_dimension_numbers<[1], [0], [0], [1], [0, 0, 1, 1], [], []>} : vector<8x76xbf16>, vector<76x512xbf16>, vector<8x512xf32> -> vector<8x512xf32>
    %c0_213 = arith.constant 0 : index
    %c0_214 = arith.constant 0 : index
    %232 = vector.load %arg6[%c0_213, %c0_214] : memref<8x1xf32, #tpu.memory_space<vmem>>, vector<8x1xf32>
    %233 = vector.broadcast %232 : vector<8x1xf32> to vector<8x512xf32>
    %234 = arith.addf %231, %233 : vector<8x512xf32>
    %cst_215 = arith.constant 0.000000e+00 : f32
    %235 = vector.broadcast %cst_215 : f32 to vector<8x512xf32>
    %236 = arith.maximumf %234, %235 : vector<8x512xf32>
    %237 = vector.extract_strided_slice %236 {offsets = [0, 0], sizes = [8, 256], strides = [1, 1]} : vector<8x512xf32> to vector<8x256xf32>
    %238 = arith.truncf %237 : vector<8x256xf32> to vector<8x256xbf16>
    %c0_216 = arith.constant 0 : index
    %c0_217 = arith.constant 0 : index
    %c0_218 = arith.constant 0 : index
    %239 = vector.load %arg7[%c0_216, %c0_217, %c0_218] : memref<2x8x256xbf16, #tpu.memory_space<vmem>>, vector<1x8x256xbf16>
    %240 = vector.shape_cast %239 : vector<1x8x256xbf16> to vector<8x256xbf16>
    %241 = vector.shape_cast %238 : vector<8x256xbf16> to vector<1x8x256xbf16>
    tpu.vector_store %arg7[%c0_216, %c0_217, %c0_218], %241 {strides = array<i32>} : memref<2x8x256xbf16, #tpu.memory_space<vmem>>, vector<1x8x256xbf16>,
    %242 = vector.extract_strided_slice %236 {offsets = [0, 256], sizes = [8, 256], strides = [1, 1]} : vector<8x512xf32> to vector<8x256xf32>
    %243 = arith.truncf %242 : vector<8x256xf32> to vector<8x256xbf16>
    %c1_219 = arith.constant 1 : index
    %c0_220 = arith.constant 0 : index
    %c0_221 = arith.constant 0 : index
    %244 = vector.load %arg7[%c1_219, %c0_220, %c0_221] : memref<2x8x256xbf16, #tpu.memory_space<vmem>>, vector<1x8x256xbf16>
    %245 = vector.shape_cast %244 : vector<1x8x256xbf16> to vector<8x256xbf16>
    %246 = vector.shape_cast %243 : vector<8x256xbf16> to vector<1x8x256xbf16>
    tpu.vector_store %arg7[%c1_219, %c0_220, %c0_221], %246 {strides = array<i32>} : memref<2x8x256xbf16, #tpu.memory_space<vmem>>, vector<1x8x256xbf16>,
    return
  }
  func.func @transform_0(%arg0: i32) -> (i32, i32, i32) {
    %c0_i32 = arith.constant 0 : i32
    %c0_i32_0 = arith.constant 0 : i32
    %c0_i32_1 = arith.constant 0 : i32
    return %arg0, %c0_i32, %c0_i32_0 : i32, i32, i32
  }
  func.func @transform_1(%arg0: i32) -> (i32, i32, i32) {
    %c0_i32 = arith.constant 0 : i32
    %c0_i32_0 = arith.constant 0 : i32
    %c0_i32_1 = arith.constant 0 : i32
    return %arg0, %c0_i32, %c0_i32_0 : i32, i32, i32
  }
  func.func @transform_2(%arg0: i32) -> (i32, i32) {
    %c0_i32 = arith.constant 0 : i32
    %c0_i32_0 = arith.constant 0 : i32
    %c0_i32_1 = arith.constant 0 : i32
    return %c0_i32, %c0_i32_0 : i32, i32
  }
  func.func @transform_3(%arg0: i32) -> (i32, i32) {
    %c0_i32 = arith.constant 0 : i32
    %c0_i32_0 = arith.constant 0 : i32
    %c0_i32_1 = arith.constant 0 : i32
    return %c0_i32, %c0_i32_0 : i32, i32
  }
  func.func @transform_4(%arg0: i32) -> (i32, i32) {
    %c0_i32 = arith.constant 0 : i32
    %c0_i32_0 = arith.constant 0 : i32
    %c0_i32_1 = arith.constant 0 : i32
    return %c0_i32, %c0_i32_0 : i32, i32
  }
  func.func @transform_5(%arg0: i32) -> (i32, i32) {
    %c0_i32 = arith.constant 0 : i32
    %c0_i32_0 = arith.constant 0 : i32
    %c0_i32_1 = arith.constant 0 : i32
    return %c0_i32, %c0_i32_0 : i32, i32
  }
  func.func @transform_6(%arg0: i32) -> (i32, i32, i32) {
    %c0_i32 = arith.constant 0 : i32
    %c0_i32_0 = arith.constant 0 : i32
    %c0_i32_1 = arith.constant 0 : i32
    return %arg0, %c0_i32, %c0_i32_0 : i32, i32, i32
  }
}

</mosaic_0001>

<bundles_post_ra>
// kernel: tpu_custom_call.1
= control target key start
LH: loop header
LB: loop body
LE: loop exit
PB: predicated region body
PF: predicated region fallthrough
CT: control target
= control target key end

     0   :  { %v25_v0 = vlaneseq  ;;  %v1518_v1 = vmov 1983009808   ;;  %v1519_v3 = vmov 0   ;;  %s1933_s0 = inlined_call_operand.vmem [shape: bf16[2,4,256], index: 0, kind: input, shape index: {}]   ;;  %s1934_s1 = inlined_call_operand.vmem [shape: f32[2,8,1], index: 1, kind: input, shape index: {}]   ;;  %s1935_s2 = inlined_call_operand.vmem [shape: bf16[8,36], index: 2, kind: input, shape index: {}]   ;;  %s1936_s3 = inlined_call_operand.vmem [shape: f32[8,1], index: 3, kind: input, shape index: {}]   ;;  %s1937_s4 = inlined_call_operand.vmem [shape: bf16[8,76], index: 4, kind: input, shape index: {}]   ;;  %s1938_s5 = inlined_call_operand.vmem [shape: f32[8,1], index: 5, kind: input, shape index: {}]   ;;  %s1939_s6 = inlined_call_operand.hbm [shape: bf16[2,8,256], index: 6, kind: output, shape index: {}]  }
   0x1   :  { %v85_v2 = vunpack.c.l.s4 %v1518_v1  ;;  %68 = vst [vmem:[#allocation2] sm:$0xff] %v1519_v3  ;;  %v74_v4 = vld [vmem:[%s1933_s0] sm:$0xf]  ;;  %69 = vst [vmem:[#allocation2 + $0x8] sm:$0xff] %v1519_v3  ;;  %v1392_v5 = vld [vmem:[%s1933_s0 + $0x4] sm:$0xf]  ;;  %721 = vmatprep.mubr.bf16.mxu0 %v1519_v3  ;;  %762 = vmatprep.mubr.bf16.mxu1 %v1519_v3 }
   0x2   :  { %70 = vst [vmem:[#allocation3] sm:$0xff] %v1519_v3  ;;  %71 = vst [vmem:[#allocation3 + $0x8] sm:$0xff] %v1519_v3  ;;  %v26_v6 = vand.u32 127, %v25_v0  ;;  %1468 = vset.pattern.permute.xlu1 %v1519_v3  ;;  %1467 = vset.pattern.permute.xlu0 %v1519_v3 }
   0x3   :  { %72 = vst [vmem:[#allocation3 + $0x10] sm:$0xff] %v1519_v3  ;;  %73 = vst [vmem:[#allocation3 + $0x18] sm:$0xff] %v1519_v3 }
   0x4   :  { %75 = vst [vmem:[#allocation2 + $0x2] sm:$0xf] %v74_v4  ;;  %79 = vst [vmem:[#allocation2 + $0xa] sm:$0xf] %v1392_v5 }
   0x5   :  { %11 = vsyncpa [#allocation6], 0  ;;  %v27_v7 = vadd.s32 128, %v26_v6  ;;  %v32_v8 = vand.u32 15, %v26_v6  ;;  %v86_v9 = vunpack.c.0.s8 %v85_v2  ;;  %v88_v10 = vshrl.u32 %v25_v0, 7  ;;  %s1521_s25 = smov 127  }
   0x6   :  { %v1520_v12 = vmov 0.0   ;;  %s1522_s26 = smov 111   ;;  %s1523_s27 = smov 1   ;;  %vm286_vm4 = vcmask 1039360   ;;  %vm94_vm5 = vcmask 908288   ;;  %vm313_vm6 = vcmask 7168  }
   0x7   :  { %v39_v11 = vand.u32 15, %v27_v7  ;;  %vm52_vm0 = vcmp.ne.s32.totalorder %v32_v8, 0  ;;  %vm60_vm1 = vcmp.ne.s32.totalorder %v32_v8, 15  ;;  %v1583_v15 = vsub.s32 %v86_v9, %v88_v10  ;;  %s1524_s28 = smov 113   ;;  %s1525_s29 = smov 15  }
   0x8   :  { %v1388_v13 = vsel %vm52_vm0, 1.0, %v1520_v12  ;;  %v1390_v14 = vsel %vm60_vm1, 1.0, %v1520_v12  ;;  %s1526_s30 = smov 17   ;;  %s1527_s7 = smov 16   ;;  %vm223_vm7 = vcmask 924672   ;;  %vm250_vm8 = vcmask 121856  }
   0x9   :  { %vm53_vm2 = vcmp.ne.s32.totalorder %v39_v11, 0  ;;  %vm61_vm3 = vcmp.ne.s32.totalorder %v39_v11, 15  ;;  %s1528_s8 = smov 112   ;;  %vm120_vm9 = vcmask 1043456   ;;  %vm178_vm10 = vcmask 130048  }
   0xa   :  { %v1389_v16 = vsel %vm53_vm2, 1.0, %v1520_v12  ;;  %v1391_v17 = vsel %vm61_vm3, 1.0, %v1520_v12  ;;  %vm122_vm11 = vcmask 138240   ;;  %vm513_vm12 = vcmask 916480  }
   0xb   :  { %v1585_v18 = vpack.c.bf16 %v1389_v16, %v1388_v13  ;;  %v1587_v19 = vpack.c.bf16 %v1391_v17, %v1390_v14  ;;  %v154_v22 = vld [vmem:[#allocation2] sm:$0x3f]  ;;  %v182_v24 = vld [vmem:[#allocation2 + $0x8] sm:$0x3f]  ;;  %vm676_vm13 = vcmask 1041408   ;;  %vm672_vm14 = vcmask 293888  }
   0xc   :  { %v156_v23 = vcombine.low %v154_v22, %v154_v22  ;;  %v170_v25 = vrot.slane %v154_v22, %v1583_v15  ;;  %v184_v27 = vcombine.low %v182_v24, %v182_v24  ;;  %v489_v28 = vld [vmem:[#allocation2 + $0x2] sm:$0x3f]  ;;  %v198_v29 = vrot.slane %v182_v24, %v1583_v15  ;;  %v517_v32 = vld [vmem:[#allocation2 + $0xa] sm:$0x3f] }
   0xd   :  { %v90_v20 = vrot.slane %v1585_v18, %v1583_v15  ;;  %v219_v21 = vrot.slane %v1587_v19, %v1583_v15  ;;  %v491_v31 = vcombine.low %v489_v28, %v489_v28  ;;  %v505_v33 = vrot.slane %v489_v28, %v1583_v15  ;;  %v282_v40 = vld [vmem:[#allocation2] sm:$0x3f]  ;;  %v317_v44 = vld [vmem:[#allocation2 + $0x8] sm:$0x3f] }
   0xe   :  { %v163_v26 = vrot.slane %v156_v23, %v1583_v15  ;;  %v191_v30 = vrot.slane %v184_v27, %v1583_v15  ;;  %v519_v35 = vcombine.low %v517_v32, %v517_v32  ;;  %v533_v36 = vrot.slane %v517_v32, %v1583_v15  ;;  %v80_v42 = vld [vmem:[#allocation2] sm:$0x3f]  ;;  %v126_v48 = vld [vmem:[#allocation2 + $0x8] sm:$0x3f] }
   0xf   :  { %283 = vrot.lane.b32.xlu1 %v90_v20, %s1521_s25  ;;  %91 = vrot.lane.b32.xlu0 %v90_v20, %s1522_s26  ;;  %v498_v34 = vrot.slane %v491_v31, %v1583_v15  ;;  %v367_v56 = vld [vmem:[#allocation2 + $0x2] sm:$0x3f]  ;;  %v400_v1 = vld [vmem:[#allocation2 + $0xa] sm:$0x3f]  ;;  %vm1254_vm15 = vcmask 1045504   ;;  %vm1250_vm0 = vcmask 621568  }
  0x10   :  { %v526_v37 = vrot.slane %v519_v35, %v1583_v15  ;;  %v209_v60 = vld [vmem:[#allocation2] sm:$0x3f]  ;;  %v254_v2 = vld [vmem:[#allocation2 + $0x8] sm:$0x3f] }
  0x11   :  { %v428_v12 = vld [vmem:[#allocation2 + $0x2] sm:$0x3f] }
  0x13   :  { %368 = vrot.lane.b32.xlu1 %v219_v21, %s1523_s27  ;;  %220 = vrot.lane.b32.xlu0 %v219_v21, %s1524_s28 }
  0x17   :  { %429 = vrot.lane.b32.xlu0 %v90_v20, %s1525_s29  ;;  %545 = vrot.lane.b32.xlu1 %v219_v21, %s1526_s30 }
  0x1b   :  { %173 = vrot.lane.b32.xlu1 %v170_v25, %s1527_s7  ;;  %171 = vrot.lane.b32.xlu0 %v163_v26, %s1527_s7 }
  0x1f   :  { %201 = vrot.lane.b32.xlu1 %v198_v29, %s1527_s7  ;;  %199 = vrot.lane.b32.xlu0 %v191_v30, %s1527_s7  ;;  %v461_v30 = vld [vmem:[#allocation2 + $0xa] sm:$0x3f] }
  0x23   :  { %508 = vrot.lane.b32.xlu1 %v505_v33, %s1528_s8  ;;  %506 = vrot.lane.b32.xlu0 %v498_v34, %s1528_s8 }
  0x27   :  { %536 = vrot.lane.b32.xlu1 %v533_v36, %s1528_s8  ;;  %534 = vrot.lane.b32.xlu0 %v526_v37, %s1528_s8 }
  0x81   :  { %v284_v38 = vpop.permute.xlu1 %283  ;;  %v92_v39 = vpop.permute.xlu0 %91 }
  0x82   :  { %v285_v41 = vrot.slane %v284_v38, 6  ;;  %v93_v43 = vrot.slane %v92_v39, 6 }
  0x84   :  { %v287_v45 = vsel %vm286_vm4, %v285_v41, %v284_v38  ;;  %v95_v46 = vsel %vm94_vm5, %v93_v43, %v92_v39 }
  0x85   :  { %v1617_v47 = vmul.bf16 %v287_v45, %v282_v40  ;;  %v1619_v49 = vmul.bf16 %v95_v46, %v80_v42  ;;  %v369_v50 = vpop.permute.xlu1 %368  ;;  %v221_v51 = vpop.permute.xlu0 %220  ;;  %v1621_v54 = vmul.bf16 %v317_v44, %v287_v45  ;;  %v1623_v55 = vmul.bf16 %v126_v48, %v95_v46  ;;  %v544_v44 = vld [vmem:[#allocation2 + $0x2] sm:$0x3f] }
  0x86   :  { %v370_v52 = vrot.slane %v369_v50, 6  ;;  %v222_v53 = vrot.slane %v221_v51, 6 }
  0x87   :  { %v305_v58 = vrot.slane %v1617_v47, %v1583_v15  ;;  %v106_v59 = vrot.slane %v1619_v49, %v1583_v15  ;;  %v334_v5 = vrot.slane %v1621_v54, %v1583_v15  ;;  %v136_v6 = vrot.slane %v1623_v55, %v1583_v15 }
  0x88   :  { %v371_v57 = vsel %vm313_vm6, %v370_v52, %v369_v50  ;;  %v224_v61 = vsel %vm223_vm7, %v222_v53, %v221_v51  ;;  %v99_v23 = vcombine.high %v1619_v49, %v1619_v49  ;;  %v129_v38 = vcombine.high %v1623_v55, %v1623_v55 }
  0x89   :  { %v430_v62 = vpop.permute.xlu0 %429  ;;  %v546_v63 = vpop.permute.xlu1 %545  ;;  %308 = vrot.lane.b32.xlu1 %v305_v58, %s1523_s27  ;;  %114 = vrot.lane.b32.xlu0 %v106_v59, %s1526_s30  ;;  %v1633_v0 = vmul.bf16 %v371_v57, %v367_v56  ;;  %v1635_v4 = vmul.bf16 %v224_v61, %v209_v60  ;;  %v1643_v10 = vmul.bf16 %v400_v1, %v371_v57 }
  0x8a   :  { %v431_v7 = vrot.slane %v430_v62, 6  ;;  %v1645_v11 = vmul.bf16 %v254_v2, %v224_v61  ;;  %v547_v31 = vrot.slane %v546_v63, 6  ;;  %v113_v41 = vrot.slane %v99_v23, %v1583_v15  ;;  %v616_v23 = vld [vmem:[%s1936_s3] sm:$0xff] }
  0x8b   :  { %v389_v14 = vrot.slane %v1633_v0, %v1583_v15  ;;  %v235_v16 = vrot.slane %v1635_v4, %v1583_v15  ;;  %v417_v25 = vrot.slane %v1643_v10, %v1583_v15  ;;  %v228_v52 = vcombine.high %v1635_v4, %v1635_v4 }
  0x8c   :  { %v432_v13 = vsel %vm250_vm8, %v431_v7, %v430_v62  ;;  %v264_v26 = vrot.slane %v1645_v11, %v1583_v15  ;;  %v548_v45 = vsel %vm122_vm11, %v547_v31, %v546_v63  ;;  %v143_v55 = vrot.slane %v129_v38, %v1583_v15 }
  0x8d   :  { %v174_v8 = vpop.permute.xlu1 %173  ;;  %v172_v9 = vpop.permute.xlu0 %171  ;;  %337 = vrot.lane.b32.xlu1 %v334_v5, %s1523_s27  ;;  %144 = vrot.lane.b32.xlu0 %v136_v6, %s1526_s30  ;;  %v434_v24 = vmul.bf16 %v432_v13, %v428_v12  ;;  %v462_v40 = vmul.bf16 %v461_v30, %v432_v13  ;;  %v550_v53 = vmul.bf16 %v548_v45, %v544_v44 }
  0x8e   :  { %v176_v17 = vrot.slane %v174_v8, 4  ;;  %v175_v22 = vrot.slane %v172_v9, 4  ;;  %v291_v59 = vcombine.low %v1617_v47, %v1617_v47  ;;  %v257_v60 = vcombine.high %v1645_v11, %v1645_v11  ;;  %v577_v8 = vld [vmem:[#allocation2 + $0xa] sm:$0x3f] }
  0x8f   :  { %v443_v42 = vrot.slane %v434_v24, %v1583_v15  ;;  %v471_v56 = vrot.slane %v462_v40, %v1583_v15  ;;  %v242_v61 = vrot.slane %v228_v52, %v1583_v15  ;;  %v559_v62 = vrot.slane %v550_v53, %v1583_v15 }
  0x90   :  { %v177_v27 = vsel %vm120_vm9, %v175_v22, %v176_v17  ;;  %v320_v63 = vcombine.low %v1621_v54, %v1621_v54  ;;  %v436_v1 = vcombine.high %v434_v24, %v434_v24  ;;  %v271_v2 = vrot.slane %v257_v60, %v1583_v15  ;;  %v775_v22 = vld [vmem:[%s1934_s1] sm:$0xff]  ;;  %v1414_v24 = vld [vmem:[%s1934_s1 + $0x8] sm:$0xff] }
  0x91   :  { %v202_v20 = vpop.permute.xlu1 %201  ;;  %v200_v21 = vpop.permute.xlu0 %199  ;;  %392 = vrot.lane.b32.xlu1 %v389_v14, %s1521_s25  ;;  %243 = vrot.lane.b32.xlu0 %v235_v16, %s1525_s29  ;;  %v179_v32 = vsel %vm178_vm10, %v172_v9, %v177_v27  ;;  %v298_v4 = vrot.slane %v291_v59, %v1583_v15  ;;  %v375_v47 = vcombine.low %v1633_v0, %v1633_v0  ;;  %v1395_v9 = vld.sshfl [vmem:[#allocation2 + $0x2] sm:$0x33 pattern:$0x76325410] }
  0x92   :  { %v204_v28 = vrot.slane %v202_v20, 4  ;;  %v203_v29 = vrot.slane %v200_v21, 4  ;;  %181 = vst [vmem:[#allocation4] sm:$0xcc] %v179_v32  ;;  %v464_v5 = vcombine.high %v462_v40, %v462_v40  ;;  %v327_v6 = vrot.slane %v320_v63, %v1583_v15  ;;  %355 = vst [vmem:[#allocation4 + $0x20] sm:$0x33] %v1395_v9 }
  0x93   :  { %v450_v7 = vrot.slane %v436_v1, %v1583_v15  ;;  %v403_v54 = vcombine.low %v1643_v10, %v1643_v10  ;;  %v552_v11 = vcombine.high %v550_v53, %v550_v53  ;;  %v578_v12 = vmul.bf16 %v577_v8, %v548_v45  ;;  %v1396_v14 = vld.sshfl [vmem:[#allocation2 + $0xa] sm:$0x33 pattern:$0x76325410] }
  0x94   :  { %v205_v35 = vsel %vm120_vm9, %v203_v29, %v204_v28  ;;  %v382_v13 = vrot.slane %v375_v47, %v1583_v15  ;;  %v478_v0 = vrot.slane %v464_v5, %v1583_v15  ;;  %366 = vst [vmem:[#allocation4 + $0x28] sm:$0x33] %v1396_v14 }
  0x95   :  { %v509_v33 = vpop.permute.xlu1 %508  ;;  %v507_v34 = vpop.permute.xlu0 %506  ;;  %420 = vrot.lane.b32.xlu1 %v417_v25, %s1521_s25  ;;  %272 = vrot.lane.b32.xlu0 %v264_v26, %s1525_s29  ;;  %v206_v39 = vsel %vm178_vm10, %v200_v21, %v205_v35  ;;  %v580_v16 = vcombine.high %v578_v12, %v578_v12  ;;  %v410_v17 = vrot.slane %v403_v54, %v1583_v15 }
  0x96   :  { %v511_v36 = vrot.slane %v509_v33, 4  ;;  %v510_v37 = vrot.slane %v507_v34, 4  ;;  %208 = vst [vmem:[#allocation4 + $0x8] sm:$0xcc] %v206_v39  ;;  %v566_v20 = vrot.slane %v552_v11, %v1583_v15  ;;  %v587_v10 = vrot.slane %v578_v12, %v1583_v15 }
  0x97   :  { %v594_v21 = vrot.slane %v580_v16, %v1583_v15 }
  0x98   :  { %v512_v43 = vsel %vm120_vm9, %v510_v37, %v511_v36 }
  0x99   :  { %v514_v46 = vsel %vm513_vm12, %v507_v34, %v512_v43  ;;  %v537_v48 = vpop.permute.xlu1 %536  ;;  %v535_v49 = vpop.permute.xlu0 %534  ;;  %116 = vrot.lane.b32.xlu1 %v113_v41, %s1526_s30  ;;  %451 = vrot.lane.b32.xlu0 %v443_v42, %s1524_s28 }
  0x9a   :  { %516 = vst [vmem:[#allocation4 + $0x30] sm:$0xcc] %v514_v46  ;;  %v539_v50 = vrot.slane %v537_v48, 4  ;;  %v538_v51 = vrot.slane %v535_v49, 4 }
  0x9c   :  { %v540_v57 = vsel %vm120_vm9, %v538_v51, %v539_v50 }
  0x9d   :  { %v541_v58 = vsel %vm513_vm12, %v535_v49, %v540_v57  ;;  %146 = vrot.lane.b32.xlu1 %v143_v55, %s1526_s30  ;;  %479 = vrot.lane.b32.xlu0 %v471_v56, %s1524_s28 }
  0x9e   :  { %543 = vst [vmem:[#allocation4 + $0x38] sm:$0xcc] %v541_v58 }
  0xa1   :  { %245 = vrot.lane.b32.xlu1 %v242_v61, %s1525_s29  ;;  %567 = vrot.lane.b32.xlu0 %v559_v62, %s1522_s26 }
  0xa5   :  { %274 = vrot.lane.b32.xlu1 %v271_v2, %s1525_s29  ;;  %306 = vrot.lane.b32.xlu0 %v298_v4, %s1523_s27 }
  0xa9   :  { %335 = vrot.lane.b32.xlu0 %v327_v6, %s1523_s27  ;;  %453 = vrot.lane.b32.xlu1 %v450_v7, %s1524_s28 }
  0xad   :  { %390 = vrot.lane.b32.xlu0 %v382_v13, %s1521_s25  ;;  %481 = vrot.lane.b32.xlu1 %v478_v0, %s1524_s28 }
  0xb1   :  { %418 = vrot.lane.b32.xlu0 %v410_v17, %s1521_s25  ;;  %569 = vrot.lane.b32.xlu1 %v566_v20, %s1522_s26 }
  0xb5   :  { %595 = vrot.lane.b32.xlu0 %v587_v10, %s1522_s26  ;;  %597 = vrot.lane.b32.xlu1 %v594_v21, %s1522_s26 }
  0xb9   :  { %778 = vperm.xlu1 %1468, %v775_v22   ;;  %619 = vperm.xlu0 %1467, %v616_v23  }
  0xbd   :  { %796 = vperm.xlu1 %1468, %v1414_v24   ;;  %816 = vrot.lane.b32.xlu0 %v1585_v18, %s1522_s26 }
  0xc1   :  { %885 = vrot.lane.b32.xlu1 %v1587_v19, %s1524_s28  ;;  %923 = vrot.lane.b32.xlu0 %v1585_v18, %s1521_s25 }
  0xc5   :  { %965 = vrot.lane.b32.xlu1 %v1587_v19, %s1523_s27  ;;  %1003 = vrot.lane.b32.xlu0 %v1585_v18, %s1525_s29 }
  0xc9   :  { %1069 = vrot.lane.b32.xlu1 %v1587_v19, %s1526_s30 }
  0xfb   :  { %v309_v15 = vpop.permute.xlu1 %308  ;;  %v115_v25 = vpop.permute.xlu0 %114 }
  0xfc   :  { %v118_v34 = vrot.slane %v115_v25, 4  ;;  %v311_v51 = vrot.slane %v309_v15, 4 }
  0xff   :  { %v338_v26 = vpop.permute.xlu1 %337  ;;  %v145_v27 = vpop.permute.xlu0 %144 }
 0x100   :  { %v148_v19 = vrot.slane %v145_v27, 4  ;;  %v340_v62 = vrot.slane %v338_v26, 4 }
 0x103   :  { %v393_v28 = vpop.permute.xlu1 %392  ;;  %v244_v29 = vpop.permute.xlu0 %243 }
 0x104   :  { %v247_v44 = vrot.slane %v244_v29, 4  ;;  %v395_v54 = vrot.slane %v393_v28, 4 }
 0x107   :  { %v1738_v30 = vpop.permute.xlu1 %420  ;;  %v273_v31 = vpop.permute.xlu0 %272 }
 0x108   :  { %v276_v52 = vrot.slane %v273_v31, 4  ;;  %v423_v22 = vrot.slane %v1738_v30, 4 }
 0x10b   :  { %v117_v32 = vpop.permute.xlu1 %116  ;;  %v452_v33 = vpop.permute.xlu0 %451 }
 0x10c   :  { %v119_v35 = vrot.slane %v117_v32, 4  ;;  %v455_v63 = vrot.slane %v452_v33, 4 }
 0x10e   :  { %v121_v36 = vsel %vm120_vm9, %v118_v34, %v119_v35 }
 0x10f   :  { %v123_v18 = vsel %vm122_vm11, %v115_v25, %v121_v36  ;;  %v147_v37 = vpop.permute.xlu1 %146  ;;  %v480_v38 = vpop.permute.xlu0 %479 }
 0x110   :  { %125 = vst [vmem:[#allocation4] sm:$0x33] %v123_v18  ;;  %v149_v39 = vrot.slane %v147_v37, 4  ;;  %v483_v9 = vrot.slane %v480_v38, 4 }
 0x112   :  { %v150_v40 = vsel %vm120_vm9, %v148_v19, %v149_v39 }
 0x113   :  { %v151_v41 = vsel %vm122_vm11, %v145_v27, %v150_v40  ;;  %v246_v42 = vpop.permute.xlu1 %245  ;;  %v568_v43 = vpop.permute.xlu0 %567 }
 0x114   :  { %153 = vst [vmem:[#allocation4 + $0x8] sm:$0x33] %v151_v41  ;;  %v248_v45 = vrot.slane %v246_v42, 4  ;;  %v571_v23 = vrot.slane %v568_v43, 4 }
 0x116   :  { %v249_v46 = vsel %vm120_vm9, %v247_v44, %v248_v45 }
 0x117   :  { %v251_v48 = vsel %vm250_vm8, %v244_v29, %v249_v46  ;;  %v275_v49 = vpop.permute.xlu1 %274  ;;  %v307_v50 = vpop.permute.xlu0 %306 }
 0x118   :  { %253 = vst [vmem:[#allocation4 + $0x10] sm:$0x33] %v251_v48  ;;  %v277_v53 = vrot.slane %v275_v49, 4  ;;  %v310_v55 = vrot.slane %v307_v50, 4 }
 0x11a   :  { %v278_v56 = vsel %vm120_vm9, %v276_v52, %v277_v53  ;;  %v312_v57 = vsel %vm120_vm9, %v310_v55, %v311_v51 }
 0x11b   :  { %v279_v58 = vsel %vm250_vm8, %v273_v31, %v278_v56  ;;  %v314_v59 = vsel %vm313_vm6, %v307_v50, %v312_v57  ;;  %v454_v60 = vpop.permute.xlu1 %453  ;;  %v336_v61 = vpop.permute.xlu0 %335  ;;  %v964_v57 = vld [vmem:[#allocation3 + $0xc] sm:$0xf] }
 0x11c   :  { %281 = vst [vmem:[#allocation4 + $0x18] sm:$0x33] %v279_v58  ;;  %316 = vst [vmem:[#allocation4 + $0x10] sm:$0xcc] %v314_v59  ;;  %v456_v1 = vrot.slane %v454_v60, 4  ;;  %v339_v2 = vrot.slane %v336_v61, 4 }
 0x11d   :  { %v986_v60 = vld [vmem:[#allocation3 + $0x1c] sm:$0xf] }
 0x11e   :  { %v457_v4 = vsel %vm120_vm9, %v455_v63, %v456_v1  ;;  %v341_v47 = vsel %vm120_vm9, %v339_v2, %v340_v62  ;;  %v1002_v63 = vld [vmem:[#allocation3 + $0xc] sm:$0xf]  ;;  %v1024_v2 = vld [vmem:[#allocation3 + $0x1c] sm:$0xf] }
 0x11f   :  { %v458_v5 = vsel %vm223_vm7, %v452_v33, %v457_v4  ;;  %v342_v6 = vsel %vm313_vm6, %v336_v61, %v341_v47  ;;  %v482_v7 = vpop.permute.xlu1 %481  ;;  %v391_v8 = vpop.permute.xlu0 %390 }
 0x120   :  { %460 = vst [vmem:[#allocation4 + $0x30] sm:$0x33] %v458_v5  ;;  %344 = vst [vmem:[#allocation4 + $0x18] sm:$0xcc] %v342_v6  ;;  %v484_v11 = vrot.slane %v482_v7, 4  ;;  %v394_v12 = vrot.slane %v391_v8, 4 }
 0x122   :  { %v485_v13 = vsel %vm120_vm9, %v483_v9, %v484_v11  ;;  %v396_v0 = vsel %vm120_vm9, %v394_v12, %v395_v54 }
 0x123   :  { %v486_v14 = vsel %vm223_vm7, %v480_v38, %v485_v13  ;;  %v397_v16 = vsel %vm286_vm4, %v391_v8, %v396_v0  ;;  %v570_v17 = vpop.permute.xlu1 %569  ;;  %v419_v20 = vpop.permute.xlu0 %418  ;;  %v1478_v10 = vld [vmem:[#allocation4 + $0x4] ss:$16 sps:$4 sm:$0xff]   ;;  %v1480_v21 = vld [vmem:[#allocation4] ss:$16 sps:$4 sm:$0xff]  }
 0x124   :  { %488 = vst [vmem:[#allocation4 + $0x38] sm:$0x33] %v486_v14  ;;  %399 = vst [vmem:[#allocation4 + $0x20] sm:$0xcc] %v397_v16  ;;  %v572_v24 = vrot.slane %v570_v17, 4  ;;  %v422_v15 = vrot.slane %v419_v20, 4  ;;  %689 = vmatprep.subr.bf16.mxu0 %v1478_v10 }
 0x125   :  { %690 = vmatpush1.bf16.msra.mxu0 %v1480_v21 }
 0x126   :  { %v573_v25 = vsel %vm120_vm9, %v571_v23, %v572_v24  ;;  %v424_v26 = vsel %vm120_vm9, %v422_v15, %v423_v22 }
 0x127   :  { %v574_v27 = vsel %vm94_vm5, %v568_v43, %v573_v25  ;;  %v425_v28 = vsel %vm286_vm4, %v419_v20, %v424_v26  ;;  %v598_v29 = vpop.permute.xlu1 %597  ;;  %v596_v31 = vpop.permute.xlu0 %595  ;;  %v1481_v32 = vld [vmem:[#allocation4 + $0xc] ss:$16 sps:$4 sm:$0xff]   ;;  %v1483_v33 = vld [vmem:[#allocation4 + $0x8] ss:$16 sps:$4 sm:$0xff]   ;;  %v605_v43 = vld [vmem:[%s1935_s2] sm:$0xf] }
 0x128   :  { %576 = vst [vmem:[#allocation4 + $0x40] sm:$0x33] %v574_v27  ;;  %427 = vst [vmem:[#allocation4 + $0x28] sm:$0xcc] %v425_v28  ;;  %v600_v30 = vrot.slane %v598_v29, 4  ;;  %v599_v34 = vrot.slane %v596_v31, 4  ;;  %730 = vmatprep.subr.bf16.mxu1 %v1481_v32 }
 0x129   :  { %731 = vmatpush1.bf16.msra.mxu1 %v1483_v33 }
 0x12a   :  { %v601_v35 = vsel %vm120_vm9, %v599_v34, %v600_v30 }
 0x12b   :  { %v602_v36 = vsel %vm94_vm5, %v596_v31, %v601_v35  ;;  %v1484_v18 = vld [vmem:[#allocation4 + $0x24] ss:$16 sps:$4 sm:$0xff]   ;;  %v1486_v37 = vld [vmem:[#allocation4 + $0x20] ss:$16 sps:$4 sm:$0xff]  }
 0x12c   :  { %604 = vst [vmem:[#allocation4 + $0x48] sm:$0x33] %v602_v36  ;;  %691 = vmatprep.subr.bf16.mxu0 %v1484_v18 }
 0x12d   :  { %692 = vmatpush1.bf16.msra.mxu0 %v1486_v37 }
 0x12f   :  { %v614_v38 = vld [vmem:[#allocation4 + $0x40] sm:$0x33]  ;;  %v1488_v19 = vld [vmem:[#allocation4 + $0x2c] ss:$16 sps:$4 sm:$0xff]   ;;  %v1491_v41 = vld [vmem:[#allocation4 + $0x28] ss:$16 sps:$4 sm:$0xff]  }
 0x130   :  { %v1406_v39 = vcombine.high %v614_v38, %v614_v38  ;;  %v1405_v40 = vcombine.low %v614_v38, %v614_v38  ;;  %732 = vmatprep.subr.bf16.mxu1 %v1488_v19 }
 0x131   :  { %733 = vmatpush1.bf16.msra.mxu1 %v1491_v41 }
 0x132   :  { %1409 = vmatprep.subr.msk.bf16.mxu0 %vm676_vm13, %v1406_v39  ;;  %v678_v42 = vsel %vm676_vm13, %v1405_v40, 0 }
 0x133   :  { %694 = vmatpush1.bf16.msra.mxu0 %v678_v42  ;;  %v615_v44 = vld [vmem:[#allocation4 + $0x48] sm:$0x33] }
 0x134   :  { %v1408_v45 = vcombine.high %v615_v44, %v615_v44  ;;  %v1407_v46 = vcombine.low %v615_v44, %v615_v44 }
 0x136   :  { %1410 = vmatmul.mubr.msk.bf16.vlgmr.msra.gmra.mrb[0].mxu0 %vm672_vm14, %v605_v43  ;;  %1411 = vmatprep.subr.msk.bf16.mxu1 %vm676_vm13, %v1408_v45  ;;  %v684_v48 = vsel %vm676_vm13, %v1407_v46, 0 }
 0x137   :  { %735 = vmatpush1.bf16.msra.mxu1 %v684_v48  ;;  %1299 = vmatprep.mubr.bf16.mxu0 %v1519_v3 }
 0x138   :  { %v779_v49 = vpop.permute.xlu1 %778  ;;  %v620_v52 = vpop.permute.xlu0 %619 }
 0x13a   :  { %1412 = vmatmul.mubr.msk.bf16.vlgmr.msra.gmra.mrb[0].mxu1 %vm672_vm14, %v605_v43 }
 0x13b   :  { %1340 = vmatprep.mubr.bf16.mxu1 %v1519_v3 }
 0x13c   :  { %v797_v50 = vpop.permute.xlu1 %796  ;;  %v817_v55 = vpop.permute.xlu0 %816 }
 0x13d   :  { %v818_v28 = vrot.slane %v817_v55, 4 }
 0x13f   :  { %v819_v30 = vsel %vm94_vm5, %v818_v28, %v817_v55 }
 0x140   :  { %v1774_v51 = vpop.permute.xlu1 %885  ;;  %v1782_v59 = vpop.permute.xlu0 %923 }
 0x141   :  { %v887_v37 = vrot.slane %v1774_v51, 4  ;;  %v925_v41 = vrot.slane %v1782_v59, 4 }
 0x143   :  { %v888_v40 = vsel %vm223_vm7, %v887_v37, %v1774_v51  ;;  %v926_v48 = vsel %vm286_vm4, %v925_v41, %v1782_v59  ;;  %v1040_v51 = vld [vmem:[#allocation3 + $0xc] sm:$0xf]  ;;  %v1418_v59 = vld.sshfl [vmem:[%s1933_s0] sm:$0x33 pattern:$0x76325410] }
 0x144   :  { %v1776_v53 = vpop.permute.xlu1 %965  ;;  %v1786_v61 = vpop.permute.xlu0 %1003  ;;  %1115 = vst [vmem:[#allocation4 + $0x90] sm:$0x33] %v1418_v59 }
 0x145   :  { %v1779_v56 = vrot.slane %v1776_v53, 4  ;;  %v1789_v62 = vrot.slane %v1786_v61, 4 }
 0x147   :  { %v972_v58 = vmul.bf16 %v1779_v56, %v964_v57  ;;  %v988_v3 = vmul.bf16 %v986_v60, %v1779_v56  ;;  %v1010_v1 = vmul.bf16 %v1789_v62, %v1002_v63  ;;  %v1026_v4 = vmul.bf16 %v1024_v2, %v1789_v62 }
 0x149   :  { %977 = vrot.lane.b32.xlu1 %v972_v58, %s1521_s25 }
 0x14d   :  { %993 = vrot.lane.b32.xlu1 %v988_v3, %s1521_s25 }
 0x151   :  { %1015 = vrot.lane.b32.xlu1 %v1010_v1, %s1524_s28  ;;  %v1068_v1 = vld [vmem:[#allocation3 + $0xc] sm:$0xf] }
 0x155   :  { %1031 = vrot.lane.b32.xlu1 %v1026_v4, %s1524_s28 }
 0x209   :  { %v723_v47 = vpop.f32.mrb[0].mxu0 }
 0x20a   :  { %v724_v5 = vadd.f32 %v723_v47, %v620_v52  ;;  %v725_v6 = vpop.f32.mrb[1].mxu0 }
 0x20b   :  { %v726_v7 = vadd.f32 %v725_v6, %v620_v52  ;;  %v727_v8 = vpop.f32.mrb[2].mxu0  ;;  %v1148_v6 = vld [vmem:[%s1938_s5] sm:$0xff] }
 0x20c   :  { %v771_v54 = vmax.f32 %v724_v5, 0.0  ;;  %v728_v9 = vpop.f32.mrb[3].mxu0  ;;  %v968_v5 = vsel %vm313_vm6, %v1779_v56, %v1776_v53  ;;  %v1420_v53 = vld.sshfl [vmem:[%s1933_s0 + $0x4] sm:$0x33 pattern:$0x76325410] }
 0x20d   :  { %v772_v11 = vmax.f32 %v726_v7, 0.0  ;;  %v764_v12 = vpop.f32.mrb[0].mxu1  ;;  %1126 = vst [vmem:[#allocation4 + $0x98] sm:$0x33] %v1420_v53 }
 0x20e   :  { %v781_v13 = vadd.f32 %v779_v49, %v771_v54  ;;  %v765_v0 = vadd.f32 %v764_v12, %v620_v52  ;;  %v766_v14 = vpop.f32.mrb[1].mxu1  ;;  %v1006_v54 = vsel %vm250_vm8, %v1789_v62, %v1786_v61 }
 0x20f   :  { %v782_v16 = vadd.f32 %v779_v49, %v772_v11  ;;  %v767_v17 = vadd.f32 %v766_v14, %v620_v52  ;;  %v768_v20 = vpop.f32.mrb[2].mxu1  ;;  %v1054_v52 = vld [vmem:[#allocation3 + $0x1c] sm:$0xf] }
 0x210   :  { %v773_v10 = vmax.f32 %v765_v0, 0.0  ;;  %v769_v21 = vpop.f32.mrb[3].mxu1  ;;  %v1469_v60 = vpack.i.bf16 %v1054_v52, %v1040_v51  ;;  %v1090_v11 = vld [vmem:[#allocation3 + $0x1c] sm:$0xf] }
 0x211   :  { %v1796_v22 = vpack.c.bf16 %v782_v16, %v781_v13  ;;  %v774_v23 = vmax.f32 %v767_v17, 0.0 }
 0x212   :  { %v799_v24 = vadd.f32 %v797_v50, %v773_v10 }
 0x213   :  { %791 = vst [vmem:[#allocation3 + $0x4] sm:$0xff] %v1796_v22  ;;  %v800_v15 = vadd.f32 %v797_v50, %v774_v23  ;;  %960 = vst [vmem:[#allocation4 + $0x40] sm:$0xff] %v1796_v22  ;;  %v1070_v50 = vpop.permute.xlu1 %1069  ;;  %v971_v7 = vmul.bf16 %v1796_v22, %v968_v5  ;;  %v1009_v56 = vmul.bf16 %v1796_v22, %v1006_v54 }
 0x214   :  { %v1071_v58 = vrot.slane %v1070_v50, 4 }
 0x215   :  { %v1800_v25 = vpack.c.bf16 %v800_v15, %v799_v24 }
 0x216   :  { %v1072_v63 = vsel %vm122_vm11, %v1071_v58, %v1070_v50  ;;  %v1076_v4 = vmul.bf16 %v1071_v58, %v1068_v1  ;;  %v1092_v12 = vmul.bf16 %v1090_v11, %v1071_v58 }
 0x217   :  { %810 = vst [vmem:[#allocation3 + $0x14] sm:$0xff] %v1800_v25  ;;  %962 = vst [vmem:[#allocation4 + $0x48] sm:$0xff] %v1800_v25  ;;  %v1075_v2 = vmul.bf16 %v1796_v22, %v1072_v63  ;;  %v1091_v47 = vmul.bf16 %v1800_v25, %v1072_v63  ;;  %v987_v8 = vmul.bf16 %v1800_v25, %v968_v5  ;;  %v1862_v61 = vpop.permute.xlu1 %977 }
 0x218   :  { %v1025_v9 = vmul.bf16 %v1800_v25, %v1006_v54 }
 0x21a   :  { %v921_v26 = vld [vmem:[#allocation3] sm:$0xff]  ;;  %v853_v27 = vld [vmem:[#allocation3 + $0x8] sm:$0xf] }
 0x21b   :  { %856 = vrot.lane.b32.xlu0 %v921_v26, %s1527_s7  ;;  %858 = vrot.lane.b32.xlu1 %v853_v27, %s1527_s7  ;;  %v812_v32 = vld [vmem:[#allocation3 + $0x8] sm:$0xf]  ;;  %v822_v35 = vmul.bf16 %v921_v26, %v819_v30  ;;  %v891_v42 = vmul.bf16 %v921_v26, %v888_v40  ;;  %v929_v55 = vmul.bf16 %v926_v48, %v921_v26  ;;  %v1864_v62 = vpop.permute.xlu1 %993 }
 0x21c   :  { %v823_v33 = vmul.bf16 %v818_v28, %v812_v32  ;;  %v881_v18 = vld [vmem:[#allocation3 + $0x8] sm:$0xf] }
 0x21d   :  { %v892_v19 = vmul.bf16 %v887_v37, %v881_v18  ;;  %v922_v44 = vld [vmem:[#allocation3 + $0x8] sm:$0xf] }
 0x21e   :  { %v866_v29 = vld [vmem:[#allocation3 + $0x10] sm:$0xff]  ;;  %v867_v31 = vld [vmem:[#allocation3 + $0x18] sm:$0xf]  ;;  %v930_v46 = vmul.bf16 %v925_v41, %v922_v44 }
 0x21f   :  { %870 = vrot.lane.b32.xlu0 %v866_v29, %s1527_s7  ;;  %872 = vrot.lane.b32.xlu1 %v867_v31, %s1527_s7  ;;  %v837_v34 = vld [vmem:[#allocation3 + $0x18] sm:$0xf]  ;;  %v838_v38 = vmul.bf16 %v866_v29, %v819_v30  ;;  %v907_v45 = vmul.bf16 %v888_v40, %v866_v29  ;;  %v945_v3 = vmul.bf16 %v926_v48, %v866_v29  ;;  %v1866_v13 = vpop.permute.xlu1 %1015 }
 0x220   :  { %v839_v36 = vmul.bf16 %v837_v34, %v818_v28  ;;  %v906_v39 = vld [vmem:[#allocation3 + $0x18] sm:$0xf] }
 0x221   :  { %v908_v43 = vmul.bf16 %v906_v39, %v887_v37  ;;  %v944_v49 = vld [vmem:[#allocation3 + $0x18] sm:$0xf] }
 0x222   :  { %v946_v57 = vmul.bf16 %v944_v49, %v925_v41 }
 0x223   :  { %1043 = vrot.lane.b32.xlu0 %v1796_v22, %s1528_s8  ;;  %828 = vrot.lane.b32.xlu1 %v823_v33, %s1526_s30  ;;  %v1868_v0 = vpop.permute.xlu1 %1031 }
 0x227   :  { %826 = vrot.lane.b32.xlu0 %v822_v35, %s1526_s30  ;;  %844 = vrot.lane.b32.xlu1 %v839_v36, %s1526_s30 }
 0x22b   :  { %842 = vrot.lane.b32.xlu0 %v838_v38, %s1526_s30  ;;  %897 = vrot.lane.b32.xlu1 %v892_v19, %s1525_s29 }
 0x22f   :  { %895 = vrot.lane.b32.xlu0 %v891_v42, %s1525_s29  ;;  %913 = vrot.lane.b32.xlu1 %v908_v43, %s1525_s29 }
 0x233   :  { %911 = vrot.lane.b32.xlu0 %v907_v45, %s1525_s29  ;;  %935 = vrot.lane.b32.xlu1 %v930_v46, %s1523_s27 }
 0x237   :  { %933 = vrot.lane.b32.xlu0 %v929_v55, %s1523_s27  ;;  %951 = vrot.lane.b32.xlu1 %v946_v57, %s1523_s27 }
 0x23b   :  { %949 = vrot.lane.b32.xlu0 %v945_v3, %s1523_s27  ;;  %1470 = vrot.lane.b32.xlu1 %v1469_v60, %s1528_s8 }
 0x23f   :  { %1057 = vrot.lane.b32.xlu0 %v1800_v25, %s1528_s8  ;;  %1079 = vrot.lane.b32.xlu1 %v1075_v2, %s1522_s26 }
 0x243   :  { %1081 = vrot.lane.b32.xlu0 %v1076_v4, %s1522_s26  ;;  %1095 = vrot.lane.b32.xlu1 %v1091_v47, %s1522_s26 }
 0x247   :  { %975 = vrot.lane.b32.xlu0 %v971_v7, %s1521_s25  ;;  %1151 = vperm.xlu1 %1468, %v1148_v6  }
 0x24b   :  { %991 = vrot.lane.b32.xlu0 %v987_v8, %s1521_s25 }
 0x24f   :  { %1013 = vrot.lane.b32.xlu0 %v1009_v56, %s1524_s28 }
 0x253   :  { %1029 = vrot.lane.b32.xlu0 %v1025_v9, %s1524_s28 }
 0x257   :  { %1097 = vrot.lane.b32.xlu0 %v1092_v12, %s1522_s26 }
 0x28d   :  { %v859_v14 = vpop.permute.xlu1 %858  ;;  %v857_v16 = vpop.permute.xlu0 %856 }
 0x28e   :  { %v861_v17 = vrot.slane %v859_v14, 4  ;;  %v860_v20 = vrot.slane %v857_v16, 4 }
 0x290   :  { %v862_v10 = vsel %vm120_vm9, %v860_v20, %v861_v17 }
 0x291   :  { %v863_v21 = vsel %vm178_vm10, %v857_v16, %v862_v10  ;;  %v873_v23 = vpop.permute.xlu1 %872  ;;  %v871_v24 = vpop.permute.xlu0 %870 }
 0x292   :  { %865 = vst [vmem:[#allocation4 + $0x10] sm:$0xff] %v863_v21  ;;  %v875_v15 = vrot.slane %v873_v23, 4  ;;  %v874_v26 = vrot.slane %v871_v24, 4 }
 0x294   :  { %v876_v27 = vsel %vm120_vm9, %v874_v26, %v875_v15 }
 0x295   :  { %v877_v28 = vsel %vm178_vm10, %v871_v24, %v876_v27  ;;  %v829_v29 = vpop.permute.xlu1 %828  ;;  %v1874_v31 = vpop.permute.xlu0 %1043 }
 0x296   :  { %879 = vst [vmem:[#allocation4 + $0x18] sm:$0xff] %v877_v28  ;;  %v831_v30 = vrot.slane %v829_v29, 4  ;;  %v1047_v11 = vrot.slane %v1874_v31, 4 }
 0x299   :  { %v845_v32 = vpop.permute.xlu1 %844  ;;  %v827_v33 = vpop.permute.xlu0 %826 }
 0x29a   :  { %v830_v34 = vrot.slane %v827_v33, 4  ;;  %v847_v38 = vrot.slane %v845_v32, 4 }
 0x29c   :  { %v832_v35 = vsel %vm120_vm9, %v830_v34, %v831_v30 }
 0x29d   :  { %v833_v36 = vsel %vm122_vm11, %v827_v33, %v832_v35  ;;  %v898_v18 = vpop.permute.xlu1 %897  ;;  %v843_v37 = vpop.permute.xlu0 %842 }
 0x29e   :  { %835 = vst [vmem:[#allocation4] sm:$0xff] %v833_v36  ;;  %v846_v19 = vrot.slane %v843_v37, 4  ;;  %v1421_v39 = vcombine.low %v833_v36, %v863_v21  ;;  %v1422_v40 = vcombine.high %v833_v36, %v863_v21  ;;  %v900_v45 = vrot.slane %v898_v18, 4 }
 0x29f   :  { %v980_v36 = vrot.slane %v1862_v61, 4  ;;  %v1018_v61 = vrot.slane %v1866_v13, 4 }
 0x2a0   :  { %v848_v41 = vsel %vm120_vm9, %v846_v19, %v847_v38  ;;  %1267 = vmatprep.subr.bf16.mxu0 %v1422_v40  ;;  %v996_v19 = vrot.slane %v1864_v62, 4 }
 0x2a1   :  { %v849_v42 = vsel %vm122_vm11, %v843_v37, %v848_v41  ;;  %v914_v43 = vpop.permute.xlu1 %913  ;;  %v896_v44 = vpop.permute.xlu0 %895  ;;  %1268 = vmatpush1.bf16.msra.mxu0 %v1421_v39 }
 0x2a2   :  { %851 = vst [vmem:[#allocation4 + $0x8] sm:$0xff] %v849_v42  ;;  %v899_v46 = vrot.slane %v896_v44, 4  ;;  %v1423_v48 = vcombine.low %v849_v42, %v877_v28  ;;  %v1424_v49 = vcombine.high %v849_v42, %v877_v28  ;;  %v916_v57 = vrot.slane %v914_v43, 4 }
 0x2a4   :  { %v901_v50 = vsel %vm120_vm9, %v899_v46, %v900_v45  ;;  %1308 = vmatprep.subr.bf16.mxu1 %v1424_v49 }
 0x2a5   :  { %v902_v51 = vsel %vm250_vm8, %v896_v44, %v901_v50  ;;  %v936_v52 = vpop.permute.xlu1 %935  ;;  %v912_v55 = vpop.permute.xlu0 %911  ;;  %1309 = vmatpush1.bf16.msra.mxu1 %v1423_v48  ;;  %v1146_v50 = vld [vmem:[#allocation4 + $0x90] sm:$0x33] }
 0x2a6   :  { %904 = vst [vmem:[#allocation4 + $0x20] sm:$0xff] %v902_v51  ;;  %v915_v58 = vrot.slane %v912_v55, 4  ;;  %v938_v1 = vrot.slane %v936_v52, 4 }
 0x2a8   :  { %v917_v60 = vsel %vm120_vm9, %v915_v58, %v916_v57 }
 0x2a9   :  { %v918_v59 = vsel %vm250_vm8, %v912_v55, %v917_v60  ;;  %v952_v3 = vpop.permute.xlu1 %951  ;;  %v934_v63 = vpop.permute.xlu0 %933 }
 0x2aa   :  { %920 = vst [vmem:[#allocation4 + $0x28] sm:$0xff] %v918_v59  ;;  %v937_v2 = vrot.slane %v934_v63, 4  ;;  %v954_v47 = vrot.slane %v952_v3, 4 }
 0x2ac   :  { %v939_v4 = vsel %vm120_vm9, %v937_v2, %v938_v1 }
 0x2ad   :  { %v940_v5 = vsel %vm313_vm6, %v934_v63, %v939_v4  ;;  %v1471_v6 = vpop.permute.xlu1 %1470  ;;  %v950_v7 = vpop.permute.xlu0 %949  ;;  %v1147_v4 = vld [vmem:[#allocation4 + $0x98] sm:$0x33] }
 0x2ae   :  { %942 = vst [vmem:[#allocation4 + $0x30] sm:$0xff] %v940_v5  ;;  %v1473_v8 = vunpack.i.h.bf16 %v1471_v6  ;;  %v1472_v54 = vunpack.i.l.bf16 %v1471_v6  ;;  %v953_v53 = vrot.slane %v950_v7, 4  ;;  %v1425_v56 = vcombine.low %v902_v51, %v940_v5 }
 0x2af   :  { %v1426_v9 = vcombine.high %v902_v51, %v940_v5  ;;  %v1034_v51 = vrot.slane %v1868_v0, 4 }
 0x2b0   :  { %v1062_v12 = vrot.slane %v1473_v8, 4  ;;  %v1048_v14 = vrot.slane %v1472_v54, 4  ;;  %v955_v16 = vsel %vm120_vm9, %v953_v53, %v954_v47 }
 0x2b1   :  { %v956_v17 = vsel %vm313_vm6, %v950_v7, %v955_v16  ;;  %v1058_v20 = vpop.permute.xlu0 %1057  ;;  %1269 = vmatprep.subr.bf16.mxu0 %v1426_v9  ;;  %v1080_v15 = vpop.permute.xlu1 %1079  ;;  %v1127_v7 = vld [vmem:[%s1937_s4] sm:$0xf]  ;;  %s1529_s4 = smov [#allocation5]  }
 0x2b2   :  { %v1049_v10 = vsel %vm120_vm9, %v1047_v11, %v1048_v14  ;;  %958 = vst [vmem:[#allocation4 + $0x38] sm:$0xff] %v956_v17  ;;  %v1061_v21 = vrot.slane %v1058_v20, 4  ;;  %1270 = vmatpush1.bf16.msra.mxu0 %v1425_v56  ;;  %v1427_v23 = vcombine.low %v918_v59, %v956_v17  ;;  %v1428_v26 = vcombine.high %v918_v59, %v956_v17  ;;  %s1377_s20 = sshll.u32 %s1529_s4, 4  ;;  %s1378_s20 = int_to_ptr.vmem [resolvable:$true] %s1377_s20 }
 0x2b3   :  { %v1050_v24 = vsel %vm513_vm12, %v1874_v31, %v1049_v10  ;;  %v1083_v32 = vrot.slane %v1080_v15, 4  ;;  %s1494_s21 = scalar_lea.vmem %s1378_s20, 256  ;;  %p1499_p1 = scmp.lt.s32.totalorder %s1378_s20, %s1378_s20 }
 0x2b4   :  { %v1063_v27 = vsel %vm120_vm9, %v1061_v21, %v1062_v12  ;;  %1310 = vmatprep.subr.bf16.mxu1 %v1428_v26  ;;  %p1495_p0 = scmp.ne.s32.totalorder %s1378_s20, %s1494_s21  ;;  %p1500_p2 = scmp.lt.s32.totalorder %s1494_s21, %s1494_s21 }
 0x2b5   :  { %v1064_v28 = vsel %vm513_vm12, %v1058_v20, %v1063_v27  ;;  %v1082_v29 = vpop.permute.xlu0 %1081  ;;  %1311 = vmatpush1.bf16.msra.mxu1 %v1427_v23  ;;  %v1096_v58 = vpop.permute.xlu1 %1095 }
 0x2b6   :  { %v1084_v33 = vrot.slane %v1082_v29, 4  ;;  %v1099_v63 = vrot.slane %v1096_v58, 4  ;;  %p1501_p3 = por %p1500_p2, %p1499_p1 }
 0x2b8   :  { %v1085_v30 = vsel %vm120_vm9, %v1083_v32, %v1084_v33  ;;  %p1502_p4 = pnand %p1501_p3, %p1495_p0 }
 0x2b9   :  { %v1086_v34 = vsel %vm94_vm5, %v1080_v15, %v1085_v30  ;;  %v976_v35 = vpop.permute.xlu0 %975 }
 0x2ba   :  { %v979_v18 = vrot.slane %v976_v35, 4  ;;  %v1438_v60 = vcombine.high %v1086_v34, %v1146_v50  ;;  %v1437_v59 = vcombine.low %v1086_v34, %v1146_v50 }
 0x2bc   :  { %v981_v31 = vsel %vm120_vm9, %v979_v18, %v980_v36  ;;  %v1256_v5 = vsel %vm1254_vm15, %v1437_v59, 0 }
 0x2bd   :  { %v982_v37 = vsel %vm286_vm4, %v976_v35, %v981_v31  ;;  %v992_v38 = vpop.permute.xlu0 %991 }
 0x2be   :  { %v995_v39 = vrot.slane %v992_v38, 4  ;;  %v1429_v40 = vcombine.low %v1796_v22, %v982_v37  ;;  %v1430_v41 = vcombine.high %v1796_v22, %v982_v37 }
 0x2c0   :  { %v997_v42 = vsel %vm120_vm9, %v995_v39, %v996_v19  ;;  %1271 = vmatprep.subr.bf16.mxu0 %v1430_v41 }
 0x2c1   :  { %v998_v43 = vsel %vm286_vm4, %v992_v38, %v997_v42  ;;  %v1014_v44 = vpop.permute.xlu0 %1013  ;;  %1272 = vmatpush1.bf16.msra.mxu0 %v1429_v40 }
 0x2c2   :  { %v1017_v45 = vrot.slane %v1014_v44, 4  ;;  %v1431_v46 = vcombine.low %v1800_v25, %v998_v43  ;;  %v1432_v48 = vcombine.high %v1800_v25, %v998_v43 }
 0x2c4   :  { %v1019_v62 = vsel %vm120_vm9, %v1017_v45, %v1018_v61  ;;  %1312 = vmatprep.subr.bf16.mxu1 %v1432_v48 }
 0x2c5   :  { %v1020_v49 = vsel %vm223_vm7, %v1014_v44, %v1019_v62  ;;  %v1030_v22 = vpop.permute.xlu0 %1029  ;;  %1313 = vmatpush1.bf16.msra.mxu1 %v1431_v46 }
 0x2c6   :  { %v1033_v52 = vrot.slane %v1030_v22, 4  ;;  %v1433_v55 = vcombine.low %v1020_v49, %v1050_v24  ;;  %v1434_v57 = vcombine.high %v1020_v49, %v1050_v24  ;;  %v1152_v56 = vpop.permute.xlu1 %1151 }
 0x2c8   :  { %v1035_v13 = vsel %vm120_vm9, %v1033_v52, %v1034_v51  ;;  %1273 = vmatprep.subr.bf16.mxu0 %v1434_v57 }
 0x2c9   :  { %v1036_v25 = vsel %vm223_vm7, %v1030_v22, %v1035_v13  ;;  %v1098_v3 = vpop.permute.xlu0 %1097  ;;  %1274 = vmatpush1.bf16.msra.mxu0 %v1433_v55 }
 0x2ca   :  { %v1100_v1 = vrot.slane %v1098_v3, 4  ;;  %1441 = vmatprep.subr.msk.bf16.mxu0 %vm1254_vm15, %v1438_v60  ;;  %v1435_v2 = vcombine.low %v1036_v25, %v1064_v28  ;;  %v1436_v0 = vcombine.high %v1036_v25, %v1064_v28 }
 0x2cc   :  { %v1101_v47 = vsel %vm120_vm9, %v1099_v63, %v1100_v1  ;;  %1314 = vmatprep.subr.bf16.mxu1 %v1436_v0 }
 0x2cd   :  { %v1102_v6 = vsel %vm94_vm5, %v1096_v58, %v1101_v47  ;;  %1276 = vmatpush1.bf16.msra.mxu0 %v1256_v5  ;;  %1315 = vmatpush1.bf16.msra.mxu1 %v1435_v2 }
 0x2ce   :  { %v1440_v8 = vcombine.high %v1102_v6, %v1147_v4  ;;  %v1439_v54 = vcombine.low %v1102_v6, %v1147_v4 }
 0x2d0   :  { %1442 = vmatmul.mubr.msk.bf16.vlgmr.msra.gmra.mrb[4].mxu0 %vm1250_vm0, %v1127_v7  ;;  %1443 = vmatprep.subr.msk.bf16.mxu1 %vm1254_vm15, %v1440_v8  ;;  %v1262_v53 = vsel %vm1254_vm15, %v1439_v54, 0 }
 0x2d1   :  { %1317 = vmatpush1.bf16.msra.mxu1 %v1262_v53 }
 0x2d4   :  { %1444 = vmatmul.mubr.msk.bf16.vlgmr.msra.gmra.mrb[4].mxu1 %vm1250_vm0, %v1127_v7 }
 0x3a3   :  { %v1301_v9 = vpop.f32.mrb[4].mxu0 }
 0x3a4   :  { %v1302_v11 = vadd.f32 %v1301_v9, %v1152_v56  ;;  %v1303_v12 = vpop.f32.mrb[5].mxu0 }
 0x3a5   :  { %v1304_v14 = vadd.f32 %v1303_v12, %v1152_v56  ;;  %v1305_v16 = vpop.f32.mrb[6].mxu0 }
 0x3a6   :  { %v1349_v17 = vmax.f32 %v1302_v11, 0.0  ;;  %v1306_v20 = vpop.f32.mrb[7].mxu0 }
 0x3a7   :  { %v1350_v10 = vmax.f32 %v1304_v14, 0.0  ;;  %v1342_v21 = vpop.f32.mrb[4].mxu1 }
 0x3a8   :  { %v1343_v23 = vadd.f32 %v1342_v21, %v1152_v56  ;;  %v1344_v24 = vpop.f32.mrb[5].mxu1 }
 0x3a9   :  { %v1451_v15 = vpack.c.bf16 %v1350_v10, %v1349_v17  ;;  %v1345_v26 = vadd.f32 %v1344_v24, %v1152_v56  ;;  %v1346_v27 = vpop.f32.mrb[6].mxu1 }
 0x3aa   :  { %v1351_v28 = vmax.f32 %v1343_v23, 0.0  ;;  %v1347_v29 = vpop.f32.mrb[7].mxu1 }
 0x3ab   :  { %1361 = vst [vmem:[#allocation5] sm:$0xff] %v1451_v15  ;;  %v1352_v32 = vmax.f32 %v1345_v26, 0.0 }
 0x3ad   :  { %v1452_v33 = vpack.c.bf16 %v1352_v32, %v1351_v28 }
 0x3af   :  { %1371 = vst [vmem:[#allocation5 + $0x8] sm:$0xff] %v1452_v33 }
 0x3b0   :  { %1505 = shalt.err (!%p1502_p4)
}
 0x3b1   :  { %s1506_s24 = scalar_lea.hbm %s1939_s6, 256 }
 0x3b2   :  { %p1507_p5 = scmp.ne.s32.totalorder %s1939_s6, %s1506_s24  ;;  %p1510_p6 = scmp.lt.u32.totalorder %s1506_s24, %s1939_s6 }
 0x3b4   :  { %p1512_p7 = pnand %p1510_p6, %p1507_p5 }
 0x3b6   :  { %1515 = shalt.err (!%p1512_p7)
}
 0x3b7   :  { %s1530_s29 = smov 128   ;;  %s1531_s30 = smov 8  }
 0x3b8   :  { %1383 = dma.vmem_to_hbm [thread:$0]  %s1378_s20, 256, %s1939_s6, [#allocation6], %s1530_s29, %s1530_s29, %s1531_s30  }
 0x3b9   :  { %1516 = dma.done.wait [#allocation6], 256  }
 0x3ba   :  { %1517 = vsyncadd [#allocation6], 4294967040 }
 0x3bb   :  { %1387 = vsyncpa [#allocation6], 1 }

</bundles_post_ra>
